<compile_context>
chip_gen: v5e
topology: v5e:2x2
jax: 0.10.0
libtpu: 0.0.40
codegen_flags: <defaults>
</compile_context>

<pallas_src>
import numpy as np
import jax
import jax.numpy as jnp
from jax.experimental import pallas as pl
from jax.experimental.pallas import tpu as pltpu

# ----- scaled-down config consistent with Audio2Mel (n_fft/hop ratio = 4) -----
N_FFT = 512
HOP = 128
WIN = 512
SR = 22050
N_MEL = 80
FMIN = 0.0
FMAX = None

N_BINS = N_FFT // 2            # onesided bins, Nyquist dropped (zero mel weight)
MEL_PAD = 128                  # lane-dense output width; sliced to N_MEL outside
FRAMES_PER_FFT = N_FFT // HOP  # = 4 hop-shifted chunks per frame
HALO = FRAMES_PER_FFT - 1      # extra chunk rows each frame tile needs
TF_DEFAULT = 512               # frames per grid step (fills the 256-wide MXU M)


# --------------------- deterministic parameter setup ---------------------
def _hz_to_mel(f):
    f = np.asarray(f, dtype=np.float64)
    f_sp = 200.0 / 3.0
    mels = f / f_sp
    min_log_hz = 1000.0
    min_log_mel = min_log_hz / f_sp
    logstep = np.log(6.4) / 27.0
    return np.where(f >= min_log_hz,
                    min_log_mel + np.log(np.maximum(f, 1e-10) / min_log_hz) / logstep,
                    mels)


def _mel_to_hz(m):
    m = np.asarray(m, dtype=np.float64)
    f_sp = 200.0 / 3.0
    freqs = f_sp * m
    min_log_hz = 1000.0
    min_log_mel = min_log_hz / f_sp
    logstep = np.log(6.4) / 27.0
    return np.where(m >= min_log_mel,
                    min_log_hz * np.exp(logstep * (m - min_log_mel)),
                    freqs)


def librosa_mel_fn(sr, n_fft, n_mels, fmin, fmax):
    """Slaney-normalized mel filterbank (matches librosa defaults)."""
    if fmax is None:
        fmax = sr / 2.0
    n_freq = n_fft // 2 + 1
    fftfreqs = np.linspace(0.0, sr / 2.0, n_freq)
    mel_pts = np.linspace(_hz_to_mel(fmin), _hz_to_mel(fmax), n_mels + 2)
    mel_f = _mel_to_hz(mel_pts)
    fdiff = np.diff(mel_f)
    ramps = mel_f[:, None] - fftfreqs[None, :]
    weights = np.zeros((n_mels, n_freq), dtype=np.float64)
    for i in range(n_mels):
        lower = -ramps[i] / fdiff[i]
        upper = ramps[i + 2] / fdiff[i + 1]
        weights[i] = np.maximum(0.0, np.minimum(lower, upper))
    enorm = 2.0 / (mel_f[2:n_mels + 2] - mel_f[:n_mels])
    weights *= enorm[:, None]
    return weights.astype(np.float32)


def make_params():
    # torch.hann_window(win_length) is periodic
    n = np.arange(WIN, dtype=np.float64)
    window = 0.5 - 0.5 * np.cos(2.0 * np.pi * n / WIN)

    # real-DFT bases X_k = sum_n x_n exp(-2*pi*i*k*n/N), k = 0..N_BINS-1
    nn = np.arange(N_FFT, dtype=np.float64)[:, None]
    kk = np.arange(N_BINS, dtype=np.float64)[None, :]
    ang = 2.0 * np.pi * nn * kk / N_FFT
    # window folded into the bases; cos|sin fused into one (n_fft, 2*N_BINS) weight
    dft_w = np.concatenate([window[:, None] * np.cos(ang),
                            window[:, None] * (-np.sin(ang))], axis=1)

    mel_basis = librosa_mel_fn(SR, N_FFT, N_MEL, FMIN, FMAX)   # (N_MEL, N_FFT//2+1)
    # Dropping the Nyquist bin is exactly lossless only while its mel weight is
    # zero (true for fmax <= sr/2).  Assert so a future FMAX change fails loudly.
    assert np.all(mel_basis[:, N_BINS] == 0.0), "Nyquist bin carries mel weight"
    # drop the Nyquist column, transpose, zero-pad the mel axis to 128 so the
    # kernel's output store is lane-dense and unmasked.
    melt = np.zeros((N_BINS, MEL_PAD), dtype=np.float64)
    melt[:, :N_MEL] = mel_basis[:, :N_BINS].T

    dft_w_bf16 = jnp.asarray(dft_w.astype(np.float32)).astype(jnp.bfloat16)
    melt_bf16 = jnp.asarray(melt.astype(np.float32)).astype(jnp.bfloat16)
    return (dft_w_bf16, melt_bf16,
            jnp.asarray(window.astype(np.float32)), jnp.asarray(mel_basis))


# ------------------------------ Pallas kernel ------------------------------
def audio2mel_kernel(chunks_ref, dftw_ref, melt_ref, out_ref, frames_ref):
    # chunks_ref : (TF+HALO, HOP)     bf16  haloed hop-sized chunks of padded audio
    # dftw_ref   : (N_FFT, 2*N_BINS)  bf16  [window*cos | window*sin]
    # melt_ref   : (N_BINS, MEL_PAD)  bf16  mel_basis.T, zero-padded to 128 lanes
    # out_ref    : (TF, MEL_PAD)      f32
    # frames_ref : (TF, N_FFT)        bf16  VMEM scratch
    tf = out_ref.shape[0]

    # Assemble this tile's overlapped frames in VMEM:
    #   frame t = concat(chunks[t], chunks[t+1], chunks[t+2], chunks[t+3]).
    # HOP is a multiple of 128 so every store is lane-tile aligned.  The k=1..3
    # reads start at sublane offsets that cross the bf16 (16,128) tile; that
    # shuffle work stays hidden under the MXU matmuls below.
    for k in range(FRAMES_PER_FFT):
        frames_ref[:, k * HOP:(k + 1) * HOP] = chunks_ref[k:k + tf, :]

    # Fused windowed real-DFT: one bf16 MXU matmul (K = n_fft) gives [real|imag].
    y = jnp.dot(frames_ref[...], dftw_ref[...], preferred_element_type=jnp.float32)
    real = y[:, :N_BINS]                                # free 128-aligned slice
    imag = y[:, N_BINS:]
    mag = jnp.sqrt(real * real + imag * imag)           # (TF, N_BINS) f32
    mel = jnp.dot(mag.astype(jnp.bfloat16), melt_ref[...],
                  preferred_element_type=jnp.float32)   # (TF, 128)
    out_ref[...] = jnp.log10(jnp.maximum(mel, 1e-5))    # unmasked, lane-dense


def audio2mel(audio, dft_w, melt, tile_frames=TF_DEFAULT):
    assert N_FFT % HOP == 0 and HOP % 128 == 0
    B, T = audio.shape
    p = (N_FFT - HOP) // 2
    assert T > p, f"reflect padding needs > {p} samples, got {T}"

    padded = jnp.pad(audio, ((0, 0), (p, p)), mode="reflect")
    t_pad = padded.shape[1]
    n_frames = (t_pad - N_FFT) // HOP + 1

    # Frames per grid step: multiple of 8 (f32 sublane tiling of the output);
    # >= 256 fills the MXU M-dim on v6e/v7x for realistic audio lengths.
    tf = min(tile_frames, -(-n_frames // 8) * 8)
    n_frames_pad = -(-n_frames // tf) * tf
    n_tiles = n_frames_pad // tf

    # bf16 per-sample quantization here is numerically identical to the old
    # in-kernel frame cast, and halves input HBM bytes + chunk VMEM.
    padded = padded.astype(jnp.bfloat16)

    # Hop-sized chunk view of the padded audio, trimmed / zero-padded so every
    # (possibly padded) frame tile has its full haloed window available.
    # Zero-padded tail frames produce log10(1e-5) rows that are sliced off below.
    n_chunks = n_frames_pad + HALO
    t_target = n_chunks * HOP
    if t_target > t_pad:
        padded = jnp.pad(padded, ((0, 0), (0, t_target - t_pad)))
    else:
        padded = padded[:, :t_target]          # never read by any valid frame
    chunks = padded.reshape(B, n_chunks, HOP)

    # Haloed frame tiles: tile i holds chunks[i*tf : i*tf + tf + HALO]
    # (~HALO/tf ~= 1% duplicated bytes at tf=512), so a plain Blocked BlockSpec
    # feeds the kernel with full auto-pipelining and ~1x audio bytes of traffic.
    idx = (np.arange(n_tiles)[:, None] * tf
           + np.arange(tf + HALO)[None, :]).reshape(-1).astype(np.int32)
    chunks_tiled = jnp.take(chunks, jnp.asarray(idx), axis=1)
    chunks_tiled = chunks_tiled.reshape(B, n_tiles, tf + HALO, HOP)

    # VMEM budget: resident weights + double-buffered chunk/out blocks +
    # frames scratch + f32 matmul temporaries, with generous headroom but
    # capped well inside v7x's 64 MiB physical VMEM.
    vmem_bytes = (
        N_FFT * 2 * N_BINS * 2            # dft weights (bf16, resident)
        + N_BINS * MEL_PAD * 2            # mel weights (bf16, resident)
        + 2 * (tf + HALO) * HOP * 2       # chunk block x2 buffers (bf16)
        + 2 * tf * MEL_PAD * 4            # out block x2 buffers (f32)
        + tf * N_FFT * 2                  # frames scratch (bf16)
        + tf * 2 * N_BINS * 4             # DFT result temporary (f32)
        + 2 * tf * N_BINS * 4)            # magnitude + misc temporaries (f32)
    vmem_limit = int(min(max(4 * vmem_bytes, 16 << 20), 32 << 20))

    out = pl.pallas_call(
        audio2mel_kernel,
        out_shape=jax.ShapeDtypeStruct((B, n_frames_pad, MEL_PAD), jnp.float32),
        grid_spec=pltpu.PrefetchScalarGridSpec(
            num_scalar_prefetch=0,
            grid=(B, n_tiles),
            in_specs=[
                pl.BlockSpec((pl.Squeezed(), pl.Squeezed(), tf + HALO, HOP),
                             lambda b, i: (b, i, 0, 0)),
                pl.BlockSpec((N_FFT, 2 * N_BINS), lambda b, i: (0, 0)),
                pl.BlockSpec((N_BINS, MEL_PAD), lambda b, i: (0, 0)),
            ],
            out_specs=pl.BlockSpec((pl.Squeezed(), tf, MEL_PAD),
                                   lambda b, i: (b, i, 0)),
            scratch_shapes=[pltpu.VMEM((tf, N_FFT), jnp.bfloat16)],
        ),
        compiler_params=pltpu.CompilerParams(
            dimension_semantics=("parallel", "parallel"),
            vmem_limit_bytes=vmem_limit),
    )(chunks_tiled, dft_w, melt)

    # drop padded frames + zero mel lanes, transpose to PyTorch layout (B, n_mel, T')
    return jnp.transpose(out[:, :n_frames, :N_MEL], (0, 2, 1))


# ------------------------- plain-JAX references -------------------------
def _frames(audio):
    p = (N_FFT - HOP) // 2
    padded = jnp.pad(audio, ((0, 0), (p, p)), mode="reflect")
    n_frames = (padded.shape[1] - N_FFT) // HOP + 1
    idx = np.arange(n_frames)[:, None] * HOP + np.arange(N_FFT)[None, :]
    return padded[:, idx]                                   # (B, T', N_FFT)


def audio2mel_ref(audio, window, mel_basis):
    """Exact f32 reference of the PyTorch module (rfft path)."""
    frames = _frames(audio) * window[None, None, :]
    mag = jnp.abs(jnp.fft.rfft(frames, axis=-1))            # (B, T', N_FFT//2+1)
    mel = jnp.einsum("mf,btf->bmt", mel_basis, mag,
                     precision=jax.lax.Precision.HIGHEST)
    return jnp.log10(jnp.maximum(mel, 1e-5))


def audio2mel_ref_bf16_inputs(audio, dft_w, melt):
    """Same math as the kernel with identical bf16 input quantization but exact
    f32 arithmetic (bf16 x bf16 products are exact in f32) — isolates
    structural/layout bugs from MXU-precision effects."""
    frames = _frames(audio).astype(jnp.bfloat16).astype(jnp.float32)
    w = dft_w.astype(jnp.float32)
    y = jnp.einsum("btn,nf->btf", frames, w, precision=jax.lax.Precision.HIGHEST)
    real, imag = y[..., :N_BINS], y[..., N_BINS:]
    mag = jnp.sqrt(real * real + imag * imag)
    mag = mag.astype(jnp.bfloat16).astype(jnp.float32)
    mel = jnp.einsum("btf,fm->btm", mag, melt.astype(jnp.float32),
                     precision=jax.lax.Precision.HIGHEST)
    out = jnp.log10(jnp.maximum(mel, 1e-5))[..., :N_MEL]
    return jnp.transpose(out, (0, 2, 1))


if __name__ == "__main__":
    key = jax.random.PRNGKey(0)
    B, T = 2, 2048
    audio = jax.random.normal(key, (B, T), dtype=jnp.float32)

    dft_w, melt, window, mel_basis = make_params()

    out = jax.block_until_ready(audio2mel(audio, dft_w, melt))

    ref = jax.block_until_ready(audio2mel_ref(audio, window, mel_basis))
    ref_q = jax.block_until_ready(audio2mel_ref_bf16_inputs(audio, dft_w, melt))
    assert out.shape == ref.shape, (out.shape, ref.shape)

    # Structural check: reference with matching bf16 input quantization.
    err_struct = float(jnp.max(jnp.abs(out - ref_q)))
    assert err_struct < 2e-2, f"kernel vs bf16-quantized reference: {err_struct}"

    # Precision check vs the exact f32/rfft reference. bf16 MXU inputs give
    # ~1e-3 typical log-mel error; the mag->bf16 cast before the mel matmul is
    # the dominant term and near-zero bins can inflate the max, so gate on mean.
    err_f32 = float(jnp.mean(jnp.abs(out - ref)))
    assert err_f32 < 5e-3, f"mean abs error vs f32 reference too large: {err_f32}"

    print("KERNEL_OK")
</pallas_src>

<mosaic_0001>
module attributes {stable_mosaic.version = 11 : i64} {
  func.func @audio2mel_kernel(%arg0: i32, %arg1: i32, %arg2: memref<1x1x19x128xbf16, #tpu.memory_space<vmem>>, %arg3: memref<512x512xbf16, #tpu.memory_space<vmem>>, %arg4: memref<256x128xbf16, #tpu.memory_space<vmem>>, %arg5: memref<1x16x128xf32, #tpu.memory_space<vmem>>, %arg6: memref<16x512xbf16, #tpu.memory_space<vmem>>) attributes {dimension_semantics = [#tpu.dimension_semantics<parallel>, #tpu.dimension_semantics<parallel>], iteration_bounds = array<i64: 2, 1>, scalar_prefetch = 0 : i64, scratch_operands = 1 : i64, tpu.core_type = #tpu.core_type<tc>, window_params = [{transform_indices = @transform_0, window_bounds = array<i64: 1, 1, 19, 128>}, {pipeline_mode = #tpu.pipeline_mode<synchronous>, transform_indices = @transform_1, window_bounds = array<i64: 512, 512>}, {pipeline_mode = #tpu.pipeline_mode<synchronous>, transform_indices = @transform_2, window_bounds = array<i64: 256, 128>}, {transform_indices = @transform_3, window_bounds = array<i64: 1, 16, 128>}]} {
    %c0 = arith.constant 0 : index
    %c0_0 = arith.constant 0 : index
    %c0_1 = arith.constant 0 : index
    %c0_2 = arith.constant 0 : index
    %0 = vector.load %arg2[%c0, %c0_0, %c0_1, %c0_2] : memref<1x1x19x128xbf16, #tpu.memory_space<vmem>>, vector<1x1x16x128xbf16>
    %1 = vector.shape_cast %0 : vector<1x1x16x128xbf16> to vector<16x128xbf16>
    %c0_3 = arith.constant 0 : index
    %c0_4 = arith.constant 0 : index
    %2 = vector.load %arg6[%c0_3, %c0_4] : memref<16x512xbf16, #tpu.memory_space<vmem>>, vector<16x128xbf16>
    tpu.vector_store %arg6[%c0_3, %c0_4], %1 {strides = array<i32>} : memref<16x512xbf16, #tpu.memory_space<vmem>>, vector<16x128xbf16>,
    %c0_5 = arith.constant 0 : index
    %c0_6 = arith.constant 0 : index
    %c1 = arith.constant 1 : index
    %c0_7 = arith.constant 0 : index
    %3 = vector.load %arg2[%c0_5, %c0_6, %c1, %c0_7] : memref<1x1x19x128xbf16, #tpu.memory_space<vmem>>, vector<1x1x16x128xbf16>
    %4 = vector.shape_cast %3 : vector<1x1x16x128xbf16> to vector<16x128xbf16>
    %c0_8 = arith.constant 0 : index
    %c128 = arith.constant 128 : index
    %5 = vector.load %arg6[%c0_8, %c128] : memref<16x512xbf16, #tpu.memory_space<vmem>>, vector<16x128xbf16>
    tpu.vector_store %arg6[%c0_8, %c128], %4 {strides = array<i32>} : memref<16x512xbf16, #tpu.memory_space<vmem>>, vector<16x128xbf16>,
    %c0_9 = arith.constant 0 : index
    %c0_10 = arith.constant 0 : index
    %c2 = arith.constant 2 : index
    %c0_11 = arith.constant 0 : index
    %6 = vector.load %arg2[%c0_9, %c0_10, %c2, %c0_11] : memref<1x1x19x128xbf16, #tpu.memory_space<vmem>>, vector<1x1x16x128xbf16>
    %7 = vector.shape_cast %6 : vector<1x1x16x128xbf16> to vector<16x128xbf16>
    %c0_12 = arith.constant 0 : index
    %c256 = arith.constant 256 : index
    %8 = vector.load %arg6[%c0_12, %c256] : memref<16x512xbf16, #tpu.memory_space<vmem>>, vector<16x128xbf16>
    tpu.vector_store %arg6[%c0_12, %c256], %7 {strides = array<i32>} : memref<16x512xbf16, #tpu.memory_space<vmem>>, vector<16x128xbf16>,
    %c0_13 = arith.constant 0 : index
    %c0_14 = arith.constant 0 : index
    %c3 = arith.constant 3 : index
    %c0_15 = arith.constant 0 : index
    %9 = vector.load %arg2[%c0_13, %c0_14, %c3, %c0_15] : memref<1x1x19x128xbf16, #tpu.memory_space<vmem>>, vector<1x1x16x128xbf16>
    %10 = vector.shape_cast %9 : vector<1x1x16x128xbf16> to vector<16x128xbf16>
    %c0_16 = arith.constant 0 : index
    %c384 = arith.constant 384 : index
    %11 = vector.load %arg6[%c0_16, %c384] : memref<16x512xbf16, #tpu.memory_space<vmem>>, vector<16x128xbf16>
    tpu.vector_store %arg6[%c0_16, %c384], %10 {strides = array<i32>} : memref<16x512xbf16, #tpu.memory_space<vmem>>, vector<16x128xbf16>,
    %c0_17 = arith.constant 0 : index
    %c0_18 = arith.constant 0 : index
    %12 = vector.load %arg6[%c0_17, %c0_18] : memref<16x512xbf16, #tpu.memory_space<vmem>>, vector<16x512xbf16>
    %c0_19 = arith.constant 0 : index
    %c0_20 = arith.constant 0 : index
    %13 = vector.load %arg3[%c0_19, %c0_20] : memref<512x512xbf16, #tpu.memory_space<vmem>>, vector<512x512xbf16>
    %cst = arith.constant dense<0.000000e+00> : vector<16x512xf32>
    %14 = tpu.matmul %12, %13, %cst {dimension_numbers = #tpu.dot_dimension_numbers<[1], [0], [0], [1], [0, 0, 1, 1], [], []>} : vector<16x512xbf16>, vector<512x512xbf16>, vector<16x512xf32> -> vector<16x512xf32>
    %15 = vector.extract_strided_slice %14 {offsets = [0, 0], sizes = [16, 256], strides = [1, 1]} : vector<16x512xf32> to vector<16x256xf32>
    %16 = vector.extract_strided_slice %14 {offsets = [0, 256], sizes = [16, 256], strides = [1, 1]} : vector<16x512xf32> to vector<16x256xf32>
    %17 = arith.mulf %15, %15 : vector<16x256xf32>
    %18 = arith.mulf %16, %16 : vector<16x256xf32>
    %19 = arith.addf %17, %18 : vector<16x256xf32>
    %20 = math.sqrt %19 : vector<16x256xf32>
    %21 = arith.truncf %20 : vector<16x256xf32> to vector<16x256xbf16>
    %c0_21 = arith.constant 0 : index
    %c0_22 = arith.constant 0 : index
    %22 = vector.load %arg4[%c0_21, %c0_22] : memref<256x128xbf16, #tpu.memory_space<vmem>>, vector<256x128xbf16>
    %cst_23 = arith.constant dense<0.000000e+00> : vector<16x128xf32>
    %23 = tpu.matmul %21, %22, %cst_23 {dimension_numbers = #tpu.dot_dimension_numbers<[1], [0], [0], [1], [0, 0, 1, 1], [], []>} : vector<16x256xbf16>, vector<256x128xbf16>, vector<16x128xf32> -> vector<16x128xf32>
    %cst_24 = arith.constant 9.99999974E-6 : f32
    %24 = vector.broadcast %cst_24 : f32 to vector<16x128xf32>
    %25 = arith.maximumf %23, %24 : vector<16x128xf32>
    %26 = math.log %25 : vector<16x128xf32>
    %cst_25 = arith.constant 0.434294492 : f32
    %27 = vector.broadcast %cst_25 : f32 to vector<16x128xf32>
    %28 = arith.mulf %26, %27 : vector<16x128xf32>
    %c0_26 = arith.constant 0 : index
    %c0_27 = arith.constant 0 : index
    %c0_28 = arith.constant 0 : index
    %29 = vector.load %arg5[%c0_26, %c0_27, %c0_28] : memref<1x16x128xf32, #tpu.memory_space<vmem>>, vector<1x16x128xf32>
    %30 = vector.shape_cast %29 : vector<1x16x128xf32> to vector<16x128xf32>
    %31 = vector.shape_cast %28 : vector<16x128xf32> to vector<1x16x128xf32>
    tpu.vector_store %arg5[%c0_26, %c0_27, %c0_28], %31 {strides = array<i32>} : memref<1x16x128xf32, #tpu.memory_space<vmem>>, vector<1x16x128xf32>,
    return
  }
  func.func @transform_0(%arg0: i32, %arg1: i32) -> (i32, i32, i32, i32) {
    %c0_i32 = arith.constant 0 : i32
    %c0_i32_0 = arith.constant 0 : i32
    %c0_i32_1 = arith.constant 0 : i32
    return %arg0, %arg1, %c0_i32, %c0_i32_0 : i32, i32, i32, i32
  }
  func.func @transform_1(%arg0: i32, %arg1: i32) -> (i32, i32) {
    %c0_i32 = arith.constant 0 : i32
    %c0_i32_0 = arith.constant 0 : i32
    %c0_i32_1 = arith.constant 0 : i32
    return %c0_i32, %c0_i32_0 : i32, i32
  }
  func.func @transform_2(%arg0: i32, %arg1: i32) -> (i32, i32) {
    %c0_i32 = arith.constant 0 : i32
    %c0_i32_0 = arith.constant 0 : i32
    %c0_i32_1 = arith.constant 0 : i32
    return %c0_i32, %c0_i32_0 : i32, i32
  }
  func.func @transform_3(%arg0: i32, %arg1: i32) -> (i32, i32, i32) {
    %c0_i32 = arith.constant 0 : i32
    %c0_i32_0 = arith.constant 0 : i32
    return %arg0, %arg1, %c0_i32 : i32, i32, i32
  }
}

</mosaic_0001>

<bundles_post_ra>
// kernel: tpu_custom_call.1
= control target key start
LH: loop header
LB: loop body
LE: loop exit
PB: predicated region body
PF: predicated region fallthrough
CT: control target
= control target key end

     0   :  { %8 = vsyncpa [#allocation4], 0  ;;  %s3007_s0 = inlined_call_operand.vmem [shape: bf16[2,1,19,128], index: 0, kind: input, shape index: {}]   ;;  %s3008_s1 = inlined_call_operand.hbm [shape: bf16[512,512], index: 1, kind: input, shape index: {}]   ;;  %s3009_s2 = inlined_call_operand.hbm [shape: bf16[256,128], index: 2, kind: input, shape index: {}]   ;;  %s3010_s3 = inlined_call_operand.hbm [shape: f32[2,16,128], index: 3, kind: output, shape index: {}]  }
   0x1   :  { %9 = vsyncpa [#allocation7], 0 }
   0x2   :  { %10 = vsyncpa [#allocation5], 0 }
   0x3   :  { %12 = vsyncpa [#allocation5 + $0x1], 0  ;;  %s2723_s12 = smov 0   ;;  %s2725_s13 = smov 0  }
   0x4   :  { %s2727_s14 = smov 0   ;;  %s2729_s15 = smov 0  }
   0x5   :  { %s2731_s16 = smov 0   ;;  %s2733_s17 = smov 0  }
   0x6 LB: > { %s1694_s18 = sadd.s32 4294967295, %s2693_s17   ;;  %s1695_s19 = sadd.s32 4294967294, %s2693_s17   ;;  %s2693_s17 = sphi %s2733_s17, %s18_s17   ;;  %s2689_s16 = sphi %s2731_s16, %s3025_s16   ;;  %s2685_s15 = sphi %s2729_s15, %s3024_s15   ;;  %s2681_s14 = sphi %s2727_s14, %s3023_s14   ;;  %s2677_s13 = sphi %s2725_s13, %s3022_s13   ;;  %s2673_s12 = sphi %s2723_s12, %s3021_s12  }
   0x7   : > { %s30_s20 = sadd.s32 1, %s2689_s16  ;;  %s109_s21 = sadd.s32 1, %s2681_s14 }
   0x8   : > { %p32_p0 = scmp.ge.s32.totalorder %s30_s20, 2  ;;  %p119_p1 = scmp.ne.s32.totalorder %s2681_s14, %s2677_s13 }
   0x9   : > { %p120_p2 = scmp.eq.s32.totalorder %s1694_s18, 1  ;;  %p125_p3 = scmp.ne.s32.totalorder %s2677_s13, %s2673_s12 }
   0xa   : > { %s3027_s20 = smov (%p32_p0, %s30_s20), 0  ;;  %p126_p5 = scmp.eq.s32.totalorder %s1695_s19, 1 }
   0xb   : > { %p2763_p4 = por %p120_p2, %p119_p1  ;;  %s104_s23 = ssub.s32 %s2689_s16, %s3027_s20 }
   0xc   : > { %p1696_p6 = scmp.ge.s32.totalorder %s2693_s17, 1  ;;  %p107_p7 = scmp.eq.s32.totalorder %s104_s23, 0 }
   0xd   : > { %p2770_p8 = por %p126_p5, %p125_p3  ;;  %p133_p9 = scmp.lt.s32.totalorder %s2693_s17, 3 }
   0xe   : > { %s2776_s25 = scalar_select %p107_p7, %s2681_s14, %s109_s21  }
   0xf   : > { %p2778_p10 = pnand %p1696_p6, %p133_p9  ;;  %p2782_p11 = scmp.eq.s32.totalorder %s1694_s18, 0 }
  0x10   : > { %s144_s30 = sshll.u32 %s3008_s1, 4  ;;  %s2695_s4 = smov [#allocation3]   ;;  %s145_s30 = int_to_ptr.hbm [resolvable:$true] %s144_s30 }
  0x11   : > { %p2463_p12 = pneg %p2778_p10  ;;  %s146_s5 = sshll.u32 %s2695_s4, 4  ;;  %s147_s5 = int_to_ptr.vmem [resolvable:$true] %s146_s5 }
  0x12   : > { %s158_s8 = sshll.u32 %s3009_s2, 4  ;;  %s2696_s9 = smov 256   ;;  %s159_s8 = int_to_ptr.hbm [resolvable:$true] %s158_s8 }
  0x13   : > { %p2464_p13 = pnand %p2782_p11, %p2463_p12  ;;  %s2697_s10 = smov 16  }
  0x14   : > { %s2698_s11 = smov [#allocation6]   ;;  %s2699_s19 = smov 64  }
  0x15   : > { %2466 = dma.hbm_to_vmem [thread:$0]  (!%p2464_p13), %s145_s30, 16384, %s147_s5, [#allocation4], %s2696_s9, %s2696_s9, %s2697_s10  }
  0x16   : > { %s160_s18 = sshll.u32 %s2698_s11, 4  ;;  %s2700_s21 = smov 4   ;;  %s161_s18 = int_to_ptr.vmem [resolvable:$true] %s160_s18 }
  0x17   : > { %2469 = dma.hbm_to_vmem [thread:$0]  (!%p2464_p13), %s159_s8, 2048, %s161_s18, [#allocation7], %s2699_s19, %s2699_s19, %s2700_s21  }
  0x18   : > { %188 = sbr.rel (%p2778_p10) target bundleno = 490 (0x1ea), region = 32 }
  0x1d   : > { %2660 = dma.done.wait (%p2782_p11), [#allocation4], 16384  }
  0x1e   : > { %2662 = vsyncadd (%p2782_p11), [#allocation4], 4294950912 }
  0x1f   : > { %2664 = dma.done.wait (%p2782_p11), [#allocation7], 2048  }
  0x20   : > { %2666 = vsyncadd (%p2782_p11), [#allocation7], 4294965248  ;;  %v1836_v0 = vld [vmem:[#allocation3 + $0xe0] sm:$0xf]  ;;  %v2337_v1 = vld [vmem:[#allocation3 + $0xec] sm:$0xf0] }
  0x21   : > { %v1964_v2 = vld [vmem:[#allocation3 + $0x1e0] sm:$0xf]  ;;  %v1837_v3 = vor.u32 %v2337_v1, %v1836_v0  ;;  %v2369_v4 = vld [vmem:[#allocation3 + $0x1ec] sm:$0xf0]  ;;  %p222_p0 = scmp.lt.s32.totalorder %s2685_s15, 1  ;;  %vm276_vm0 = vcmask 1042432  }
  0x22   : > { %v2092_v5 = vld [vmem:[#allocation3 + $0x2e0] sm:$0xf]  ;;  %v2401_v6 = vld [vmem:[#allocation3 + $0x2ec] sm:$0xf0]  ;;  %v1965_v7 = vor.u32 %v2369_v4, %v1964_v2  ;;  %vm277_vm1 = vcmask 1046532   ;;  %s219_s30 = sand.u32 1, %s2677_s13  }
  0x23   : > { %v2093_v8 = vor.u32 %v2401_v6, %v2092_v5  ;;  %v2220_v9 = vld [vmem:[#allocation3 + $0x3e0] sm:$0xf]  ;;  %v2433_v10 = vld [vmem:[#allocation3 + $0x3ec] sm:$0xf0]  ;;  %1120 = vmatpush.bf16.msra.mxu0 %v1837_v3  ;;  %s2810_s23 = scalar_select %p222_p0, %s2685_s15, 1  ;;  %vm2841_vm2 = vmor %vm276_vm0, %vm277_vm1 }
  0x24   : > { %v1820_v11 = vld [vmem:[#allocation3 + $0xc0] sm:$0xf]  ;;  %v2221_v12 = vor.u32 %v2433_v10, %v2220_v9  ;;  %v2333_v13 = vld [vmem:[#allocation3 + $0xcc] sm:$0xf0]  ;;  %1134 = vmatpush.bf16.msra.mxu1 %v1965_v7  ;;  %vm293_vm3 = vsmask.f32 2304 }
  0x25   : > { %v1948_v14 = vld [vmem:[#allocation3 + $0x1c0] sm:$0xf]  ;;  %v2365_v15 = vld [vmem:[#allocation3 + $0x1cc] sm:$0xf0]  ;;  %1148 = vmatpush.bf16.msra.mxu2 %v2093_v8  ;;  %v1821_v16 = vor.u32 %v2333_v13, %v1820_v11  ;;  %s2452_s26 = smul.u32 12, %s2810_s23  ;;  %s1703_s4 = sshll.u32 %s219_s30, 4 }
  0x26   : > { %v1949_v17 = vor.u32 %v2365_v15, %v1948_v14  ;;  %v2076_v18 = vld [vmem:[#allocation3 + $0x2c0] sm:$0xf]  ;;  %v2397_v19 = vld [vmem:[#allocation3 + $0x2cc] sm:$0xf0]  ;;  %1162 = vmatpush.bf16.msra.mxu3 %v2221_v12  ;;  %vm294_vm4 = vsmask.f32 6416 }
  0x27   : > { %v2204_v20 = vld [vmem:[#allocation3 + $0x3c0] sm:$0xf]  ;;  %v2077_v21 = vor.u32 %v2397_v19, %v2076_v18  ;;  %v2429_v22 = vld [vmem:[#allocation3 + $0x3cc] sm:$0xf0]  ;;  %1121 = vmatpush.bf16.msra.mxu0 %v1821_v16  ;;  %s2832_s29 = scalar_lea.vmem %s3007_s0, %s2452_s26  ;;  %vm2883_vm5 = vmor %vm293_vm3, %vm294_vm4  ;;  %vm239_vm6 = vsmask.f32 3328 }
  0x28   : > { %v1804_v23 = vld [vmem:[#allocation3 + $0xa0] sm:$0xf]  ;;  %v2329_v24 = vld [vmem:[#allocation3 + $0xac] sm:$0xf0]  ;;  %v2205_v25 = vor.u32 %v2429_v22, %v2204_v20  ;;  %1135 = vmatpush.bf16.msra.mxu1 %v1949_v17  ;;  %vm240_vm7 = vsmask.f32 7440 }
  0x29   : > { %v1932_v26 = vld [vmem:[#allocation3 + $0x1a0] sm:$0xf]  ;;  %v2361_v27 = vld [vmem:[#allocation3 + $0x1ac] sm:$0xf0]  ;;  %v1805_v29 = vor.u32 %v2329_v24, %v1804_v23  ;;  %1149 = vmatpush.bf16.msra.mxu2 %v2077_v21  ;;  %vm2913_vm8 = vmor %vm239_vm6, %vm240_vm7  ;;  %s2451_s5 = sshll.u32 %s2685_s15, 4  ;;  %s221_s6 = scalar_lea.vmem [#allocation8], %s1703_s4 }
  0x2a   : > { %v2060_v28 = vld [vmem:[#allocation3 + $0x2a0] sm:$0xf]  ;;  %v2393_v30 = vld [vmem:[#allocation3 + $0x2ac] sm:$0xf0]  ;;  %v1933_v33 = vor.u32 %v2361_v27, %v1932_v26  ;;  %1163 = vmatpush.bf16.msra.mxu3 %v2205_v25  ;;  %s1586_s9 = scalar_lea.hbm %s3010_s3, %s2451_s5  ;;  %s1587_s10 = sshll.u32 %s221_s6, 4  ;;  %s1588_s10 = int_to_ptr.vmem [resolvable:$true] %s1587_s10 }
  0x2b   : > { %v2188_v31 = vld [vmem:[#allocation3 + $0x3a0] sm:$0xf]  ;;  %v2425_v32 = vld [vmem:[#allocation3 + $0x3ac] sm:$0xf0]  ;;  %v2061_v34 = vor.u32 %v2393_v30, %v2060_v28  ;;  %1122 = vmatpush.bf16.msra.mxu0 %v1805_v29  ;;  %v2335_v28 = vld [vmem:[#allocation3 + $0xe4] sm:$0xf] }
  0x2c   : > { %v1788_v35 = vld [vmem:[#allocation3 + $0x80] sm:$0xf]  ;;  %v2325_v36 = vld [vmem:[#allocation3 + $0x8c] sm:$0xf0]  ;;  %v2189_v38 = vor.u32 %v2425_v32, %v2188_v31  ;;  %1136 = vmatpush.bf16.msra.mxu1 %v1933_v33  ;;  %v1838_v29 = vld [vmem:[#allocation3 + $0xf0] sm:$0xf0] }
  0x2d   : > { %v1916_v37 = vld [vmem:[#allocation3 + $0x180] sm:$0xf]  ;;  %v2357_v39 = vld [vmem:[#allocation3 + $0x18c] sm:$0xf0]  ;;  %v1789_v44 = vor.u32 %v2325_v36, %v1788_v35  ;;  %1150 = vmatpush.bf16.msra.mxu2 %v2061_v34  ;;  %v2367_v30 = vld [vmem:[#allocation3 + $0x1e4] sm:$0xf] }
  0x2e   : > { %v2044_v40 = vld [vmem:[#allocation3 + $0x280] sm:$0xf]  ;;  %v2389_v41 = vld [vmem:[#allocation3 + $0x28c] sm:$0xf0]  ;;  %v1917_v45 = vor.u32 %v2357_v39, %v1916_v37  ;;  %1164 = vmatpush.bf16.msra.mxu3 %v2189_v38  ;;  %v1966_v32 = vld [vmem:[#allocation3 + $0x1f0] sm:$0xf0] }
  0x2f   : > { %v2172_v42 = vld [vmem:[#allocation3 + $0x380] sm:$0xf]  ;;  %v2421_v43 = vld [vmem:[#allocation3 + $0x38c] sm:$0xf0]  ;;  %v2045_v46 = vor.u32 %v2389_v41, %v2044_v40  ;;  %1123 = vmatpush.bf16.msra.mxu0 %v1789_v44  ;;  %v2399_v33 = vld [vmem:[#allocation3 + $0x2e4] sm:$0xf]  ;;  %v1841_v40 = vor.u32 %v2335_v28, %v1838_v29 }
  0x30   : > { %v1772_v47 = vld [vmem:[#allocation3 + $0x60] sm:$0xf]  ;;  %v2321_v48 = vld [vmem:[#allocation3 + $0x6c] sm:$0xf0]  ;;  %v2173_v50 = vor.u32 %v2421_v43, %v2172_v42  ;;  %1137 = vmatpush.bf16.msra.mxu1 %v1917_v45  ;;  %v2094_v34 = vld [vmem:[#allocation3 + $0x2f0] sm:$0xf0]  ;;  %v1969_v43 = vor.u32 %v2367_v30, %v1966_v32 }
  0x31   : > { %v1900_v49 = vld [vmem:[#allocation3 + $0x160] sm:$0xf]  ;;  %v2353_v51 = vld [vmem:[#allocation3 + $0x16c] sm:$0xf0]  ;;  %v1773_v56 = vor.u32 %v2321_v48, %v1772_v47  ;;  %1151 = vmatpush.bf16.msra.mxu2 %v2045_v46  ;;  %v2431_v37 = vld [vmem:[#allocation3 + $0x3e4] sm:$0xf]  ;;  %v2097_v44 = vor.u32 %v2399_v33, %v2094_v34 }
  0x32   : > { %v2028_v52 = vld [vmem:[#allocation3 + $0x260] sm:$0xf]  ;;  %v2385_v53 = vld [vmem:[#allocation3 + $0x26c] sm:$0xf0]  ;;  %v1901_v57 = vor.u32 %v2353_v51, %v1900_v49  ;;  %1165 = vmatpush.bf16.msra.mxu3 %v2173_v50  ;;  %v2222_v38 = vld [vmem:[#allocation3 + $0x3f0] sm:$0xf0] }
  0x33   : > { %v2156_v54 = vld [vmem:[#allocation3 + $0x360] sm:$0xf]  ;;  %v2417_v55 = vld [vmem:[#allocation3 + $0x36c] sm:$0xf0]  ;;  %v2029_v58 = vor.u32 %v2385_v53, %v2028_v52  ;;  %1124 = vmatpush.bf16.msra.mxu0 %v1773_v56  ;;  %v2331_v41 = vld [vmem:[#allocation3 + $0xc4] sm:$0xf]  ;;  %v2225_v48 = vor.u32 %v2431_v37, %v2222_v38 }
  0x34   : > { %v1756_v59 = vld [vmem:[#allocation3 + $0x40] sm:$0xf]  ;;  %v2317_v60 = vld [vmem:[#allocation3 + $0x4c] sm:$0xf0]  ;;  %v2157_v62 = vor.u32 %v2417_v55, %v2156_v54  ;;  %1138 = vmatpush.bf16.msra.mxu1 %v1901_v57  ;;  %v1822_v42 = vld [vmem:[#allocation3 + $0xd0] sm:$0xf0] }
  0x35   : > { %v1884_v61 = vld [vmem:[#allocation3 + $0x140] sm:$0xf]  ;;  %v2349_v63 = vld [vmem:[#allocation3 + $0x14c] sm:$0xf0]  ;;  %v1757_v4 = vor.u32 %v2317_v60, %v1756_v59  ;;  %1152 = vmatpush.bf16.msra.mxu2 %v2029_v58  ;;  %v2363_v45 = vld [vmem:[#allocation3 + $0x1c4] sm:$0xf]  ;;  %v1825_v55 = vor.u32 %v2331_v41, %v1822_v42 }
  0x36   : > { %v2012_v0 = vld [vmem:[#allocation3 + $0x240] sm:$0xf]  ;;  %v2381_v1 = vld [vmem:[#allocation3 + $0x24c] sm:$0xf0]  ;;  %v1885_v5 = vor.u32 %v2349_v63, %v1884_v61  ;;  %1166 = vmatpush.bf16.msra.mxu3 %v2157_v62  ;;  %v1950_v46 = vld [vmem:[#allocation3 + $0x1d0] sm:$0xf0] }
  0x37   : > { %v2140_v2 = vld [vmem:[#allocation3 + $0x340] sm:$0xf]  ;;  %v2413_v3 = vld [vmem:[#allocation3 + $0x34c] sm:$0xf0]  ;;  %v2013_v6 = vor.u32 %v2381_v1, %v2012_v0  ;;  %1125 = vmatpush.bf16.msra.mxu0 %v1757_v4  ;;  %v2395_v47 = vld [vmem:[#allocation3 + $0x2c4] sm:$0xf]  ;;  %v1953_v59 = vor.u32 %v2363_v45, %v1950_v46 }
  0x38   : > { %v1740_v7 = vld [vmem:[#allocation3 + $0x20] sm:$0xf]  ;;  %v2313_v8 = vld [vmem:[#allocation3 + $0x2c] sm:$0xf0]  ;;  %v2141_v10 = vor.u32 %v2413_v3, %v2140_v2  ;;  %1139 = vmatpush.bf16.msra.mxu1 %v1885_v5  ;;  %v2078_v49 = vld [vmem:[#allocation3 + $0x2d0] sm:$0xf0] }
  0x39   : > { %v1868_v9 = vld [vmem:[#allocation3 + $0x120] sm:$0xf]  ;;  %v2345_v11 = vld [vmem:[#allocation3 + $0x12c] sm:$0xf0]  ;;  %v1741_v16 = vor.u32 %v2313_v8, %v1740_v7  ;;  %1153 = vmatpush.bf16.msra.mxu2 %v2013_v6  ;;  %v2427_v50 = vld [vmem:[#allocation3 + $0x3c4] sm:$0xf]  ;;  %v2081_v60 = vor.u32 %v2395_v47, %v2078_v49 }
  0x3a   : > { %v1996_v12 = vld [vmem:[#allocation3 + $0x220] sm:$0xf]  ;;  %v2377_v13 = vld [vmem:[#allocation3 + $0x22c] sm:$0xf0]  ;;  %v1869_v19 = vor.u32 %v2345_v11, %v1868_v9  ;;  %1167 = vmatpush.bf16.msra.mxu3 %v2141_v10  ;;  %v2206_v51 = vld [vmem:[#allocation3 + $0x3d0] sm:$0xf0] }
  0x3b   : > { %v2124_v14 = vld [vmem:[#allocation3 + $0x320] sm:$0xf]  ;;  %v2409_v15 = vld [vmem:[#allocation3 + $0x32c] sm:$0xf0]  ;;  %v1997_v20 = vor.u32 %v2377_v13, %v1996_v12  ;;  %1126 = vmatpush.bf16.msra.mxu0 %v1741_v16  ;;  %v2327_v52 = vld [vmem:[#allocation3 + $0xa4] sm:$0xf]  ;;  %v2209_v0 = vor.u32 %v2427_v50, %v2206_v51 }
  0x3c   : > { %v1724_v17 = vld [vmem:[#allocation3] sm:$0xf]  ;;  %v2309_v18 = vld [vmem:[#allocation3 + $0xc] sm:$0xf0]  ;;  %v2125_v24 = vor.u32 %v2409_v15, %v2124_v14  ;;  %1140 = vmatpush.bf16.msra.mxu1 %v1869_v19  ;;  %v1806_v53 = vld [vmem:[#allocation3 + $0xb0] sm:$0xf0] }
  0x3d   : > { %v1852_v21 = vld [vmem:[#allocation3 + $0x100] sm:$0xf]  ;;  %v2341_v22 = vld [vmem:[#allocation3 + $0x10c] sm:$0xf0]  ;;  %v1725_v31 = vor.u32 %v2309_v18, %v1724_v17  ;;  %1154 = vmatpush.bf16.msra.mxu2 %v1997_v20  ;;  %v2359_v54 = vld [vmem:[#allocation3 + $0x1a4] sm:$0xf]  ;;  %v1809_v7 = vor.u32 %v2327_v52, %v1806_v53 }
  0x3e   : > { %v1980_v23 = vld [vmem:[#allocation3 + $0x200] sm:$0xf]  ;;  %v2373_v25 = vld [vmem:[#allocation3 + $0x20c] sm:$0xf0]  ;;  %v1853_v35 = vor.u32 %v2341_v22, %v1852_v21  ;;  %1168 = vmatpush.bf16.msra.mxu3 %v2125_v24  ;;  %v1934_v56 = vld [vmem:[#allocation3 + $0x1b0] sm:$0xf0] }
  0x3f   : > { %v2108_v26 = vld [vmem:[#allocation3 + $0x300] sm:$0xf]  ;;  %v2405_v27 = vld [vmem:[#allocation3 + $0x30c] sm:$0xf0]  ;;  %v1981_v36 = vor.u32 %v2373_v25, %v1980_v23  ;;  %1127 = vmatpush.bf16.msra.mxu0 %v1725_v31  ;;  %v2391_v57 = vld [vmem:[#allocation3 + $0x2a4] sm:$0xf]  ;;  %v1937_v8 = vor.u32 %v2359_v54, %v1934_v56 }
  0x40   : > { %v2109_v39 = vor.u32 %v2405_v27, %v2108_v26  ;;  %1141 = vmatpush.bf16.msra.mxu1 %v1853_v35  ;;  %v2062_v58 = vld [vmem:[#allocation3 + $0x2b0] sm:$0xf0]  ;;  %v2423_v61 = vld [vmem:[#allocation3 + $0x3a4] sm:$0xf]  ;;  %v270_v10 = vld [vmem:[%s2832_s29] sm:$0xe] }
  0x41   : > { %1155 = vmatpush.bf16.msra.mxu2 %v1981_v36  ;;  %v2190_v62 = vld [vmem:[#allocation3 + $0x3b0] sm:$0xf0]  ;;  %v2813_v63 = vld [vmem:[#allocation3 + $0x84] sm:$0xf]  ;;  %v2065_v12 = vor.u32 %v2391_v57, %v2062_v58  ;;  %v272_v13 = vld [vmem:[%s2832_s29 + $0x8] sm:$0x1] }
  0x42   : > { %1169 = vmatpush.bf16.msra.mxu3 %v2109_v39  ;;  %v2815_v1 = vld [vmem:[#allocation3 + $0x90] sm:$0xf0]  ;;  %v2817_v2 = vld [vmem:[#allocation3 + $0x184] sm:$0xf]  ;;  %v1705_v14 = vrot.slane %v270_v10, 9  ;;  %v2193_v15 = vor.u32 %v2423_v61, %v2190_v62  ;;  %v284_v19 = vrot.slane %v272_v13, 5 }
  0x43   : > { %1176 = vmatpush.bf16.msrb.mxu0 %v1841_v40  ;;  %v2819_v3 = vld [vmem:[#allocation3 + $0x190] sm:$0xf0]  ;;  %v2821_v4 = vld [vmem:[#allocation3 + $0x284] sm:$0xf]  ;;  %v1793_v16 = vor.u32 %v2813_v63, %v2815_v1  ;;  %v290_v20 = vld [vmem:[%s2832_s29] sm:$0xe] }
  0x44   : > { %1190 = vmatpush.bf16.msrb.mxu1 %v1969_v43  ;;  %v2823_v5 = vld [vmem:[#allocation3 + $0x290] sm:$0xf0]  ;;  %v2825_v6 = vld [vmem:[#allocation3 + $0x384] sm:$0xf]  ;;  %v1921_v22 = vor.u32 %v2817_v2, %v2819_v3  ;;  %v292_v29 = vld [vmem:[%s2832_s29 + $0x8] sm:$0x3] }
  0x45   : > { %1204 = vmatpush.bf16.msrb.mxu2 %v2097_v44  ;;  %v2834_v9 = vld [vmem:[#allocation3 + $0x390] sm:$0xf0]  ;;  %v271_v11 = vld [vmem:[%s2832_s29 + $0x4] sm:$0xf]  ;;  %v2049_v23 = vor.u32 %v2821_v4, %v2823_v5  ;;  %v297_v34 = vshrl.u32 %v290_v20, 16  ;;  %v300_v35 = vshll.u32 %v290_v20, 16 }
  0x46   : > { %1218 = vmatpush.bf16.msrb.mxu3 %v2225_v48  ;;  %v281_v18 = vrot.slane %v271_v11, 5  ;;  %v291_v21 = vld [vmem:[%s2832_s29 + $0x4] sm:$0xf]  ;;  %v2177_v24 = vor.u32 %v2825_v6, %v2834_v9  ;;  %v1774_v26 = vld [vmem:[#allocation3 + $0x70] sm:$0xf0]  ;;  %v316_v39 = vshrl.u32 %v292_v29, 16 }
  0x47   : > { %1177 = vmatpush.bf16.msrb.mxu0 %v1825_v55  ;;  %v2853_v25 = vld [vmem:[#allocation3 + $0x64] sm:$0xf]  ;;  %v2857_v28 = vld [vmem:[#allocation3 + $0x170] sm:$0xf0]  ;;  %v306_v37 = vshrl.u32 %v291_v21, 16  ;;  %v309_v38 = vshll.u32 %v291_v21, 16 }
  0x48   : > { %1191 = vmatpush.bf16.msrb.mxu1 %v1953_v59  ;;  %v2855_v27 = vld [vmem:[#allocation3 + $0x164] sm:$0xf]  ;;  %v2862_v31 = vld [vmem:[#allocation3 + $0x270] sm:$0xf0]  ;;  %v282_v32 = vsel %vm2841_vm2, %v1705_v14, %v281_v18  ;;  %v283_v33 = vrot.slane %v281_v18, 4  ;;  %v319_v40 = vshll.u32 %v292_v29, 16  ;;  %v1777_v52 = vor.u32 %v2853_v25, %v1774_v26 }
  0x49   : > { %1205 = vmatpush.bf16.msrb.mxu2 %v2081_v60  ;;  %v2860_v30 = vld [vmem:[#allocation3 + $0x264] sm:$0xf]  ;;  %288 = vst [vmem:[#allocation2 + $0x8] sm:$0xf] %v282_v32  ;;  %v2158_v41 = vld [vmem:[#allocation3 + $0x370] sm:$0xf0]  ;;  %v1905_v53 = vor.u32 %v2855_v27, %v2857_v28 }
  0x4a   : > { %1219 = vmatpush.bf16.msrb.mxu3 %v2209_v0  ;;  %v2866_v36 = vld [vmem:[#allocation3 + $0x364] sm:$0xf]  ;;  %v285_v42 = vsel %vm2841_vm2, %v283_v33, %v284_v19  ;;  %v299_v43 = vrot.slane %v297_v34, 5  ;;  %v302_v44 = vrot.slane %v300_v35, 6  ;;  %v2872_v46 = vld [vmem:[#allocation3 + $0x50] sm:$0xf0]  ;;  %v2033_v58 = vor.u32 %v2860_v30, %v2862_v31 }
  0x4b   : > { %1178 = vmatpush.bf16.msrb.mxu0 %v1809_v7  ;;  %v2870_v45 = vld [vmem:[#allocation3 + $0x44] sm:$0xf]  ;;  %289 = vst [vmem:[#allocation2 + $0x18] sm:$0xf] %v285_v42  ;;  %v308_v48 = vrot.slane %v306_v37, 5  ;;  %v311_v49 = vrot.slane %v309_v38, 6  ;;  %v2161_v1 = vor.u32 %v2866_v36, %v2158_v41 }
  0x4c   : > { %1192 = vmatpush.bf16.msrb.mxu1 %v1937_v8  ;;  %v2874_v47 = vld [vmem:[#allocation3 + $0x144] sm:$0xf]  ;;  %v318_v50 = vrot.slane %v316_v39, 5  ;;  %v321_v51 = vrot.slane %v319_v40, 6  ;;  %v1886_v54 = vld [vmem:[#allocation3 + $0x150] sm:$0xf0]  ;;  %v303_v57 = vor.u32 %v302_v44, %v299_v43  ;;  %v1761_v10 = vor.u32 %v2870_v45, %v2872_v46 }
  0x4d   : > { %1206 = vmatpush.bf16.msrb.mxu2 %v2065_v12  ;;  %v2379_v55 = vld [vmem:[#allocation3 + $0x244] sm:$0xf]  ;;  %v2014_v56 = vld [vmem:[#allocation3 + $0x250] sm:$0xf0]  ;;  %v312_v62 = vor.u32 %v311_v49, %v308_v48  ;;  %v232_v0 = vld [vmem:[%s2832_s29] sm:$0xf]  ;;  %v1889_v11 = vor.u32 %v2874_v47, %v1886_v54 }
  0x4e   : > { %1220 = vmatpush.bf16.msrb.mxu3 %v2193_v15  ;;  %v2411_v59 = vld [vmem:[#allocation3 + $0x344] sm:$0xf]  ;;  %v2142_v60 = vld [vmem:[#allocation3 + $0x350] sm:$0xf0]  ;;  %v322_v63 = vor.u32 %v321_v51, %v318_v50  ;;  %v304_v2 = vrot.slane %v303_v57, 4  ;;  %v2017_v18 = vor.u32 %v2379_v55, %v2014_v56  ;;  %s1589_s11 = sshll.u32 %s1586_s9, 4  ;;  %s1590_s11 = int_to_ptr.hbm [resolvable:$true] %s1589_s11 }
  0x4f   : > { %1179 = vmatpush.bf16.msrb.mxu0 %v1793_v16  ;;  %v233_v3 = vld [vmem:[%s2832_s29 + $0x4] sm:$0xf]  ;;  %234 = vst [vmem:[#allocation2] sm:$0xf] %v232_v0  ;;  %v314_v4 = vrot.slane %v312_v62, 4  ;;  %s1573_s18 = scalar_lea.sflag [#allocation5], %s219_s30 }
  0x50   : > { %1193 = vmatpush.bf16.msrb.mxu1 %v1921_v22  ;;  %v2890_v5 = vld [vmem:[#allocation3 + $0x24] sm:$0xf]  ;;  %v1742_v6 = vld [vmem:[#allocation3 + $0x30] sm:$0xf0]  ;;  %235 = vst [vmem:[#allocation2 + $0x10] sm:$0xf] %v233_v3  ;;  %v313_v13 = vsel %vm2883_vm5, %v304_v2, %v312_v62  ;;  %v2145_v22 = vor.u32 %v2411_v59, %v2142_v60 }
  0x51   : > { %1207 = vmatpush.bf16.msrb.mxu2 %v2049_v23  ;;  %v2892_v7 = vld [vmem:[#allocation3 + $0x124] sm:$0xf]  ;;  %v2894_v8 = vld [vmem:[#allocation3 + $0x130] sm:$0xf0]  ;;  %v236_v9 = vld [vmem:[%s2832_s29] sm:$0xf]  ;;  %v323_v19 = vsel %vm2883_vm5, %v314_v4, %v322_v63  ;;  %v1745_v31 = vor.u32 %v2890_v5, %v1742_v6 }
  0x52   : > { %1221 = vmatpush.bf16.msrb.mxu3 %v2177_v24  ;;  %v1716_v12 = vld [vmem:[#allocation2 + $0x8] sm:$0xf]  ;;  %v2375_v14 = vld [vmem:[#allocation3 + $0x224] sm:$0xf]  ;;  %v1998_v15 = vld [vmem:[#allocation3 + $0x230] sm:$0xf0]  ;;  %v1873_v32 = vor.u32 %v2892_v7, %v2894_v8 }
  0x53   : > { %1180 = vmatpush.bf16.msrb.mxu0 %v1777_v52  ;;  %v237_v16 = vld [vmem:[%s2832_s29 + $0x4] sm:$0xf]  ;;  %v238_v17 = vld [vmem:[%s2832_s29 + $0x8] sm:$0x1]  ;;  %326 = vst [vmem:[#allocation2 + $0xc] sm:$0xf] %v313_v13  ;;  %v2001_v37 = vor.u32 %v2375_v14, %v1998_v15 }
  0x54   : > { %1194 = vmatpush.bf16.msrb.mxu1 %v1905_v53  ;;  %v2407_v20 = vld [vmem:[#allocation3 + $0x324] sm:$0xf]  ;;  %v2126_v21 = vld [vmem:[#allocation3 + $0x330] sm:$0xf0]  ;;  %v2306_v23 = vld [vmem:[#allocation2 + $0x14] sm:$0xf0] }
  0x55   : > { %1208 = vmatpush.bf16.msrb.mxu2 %v2033_v58  ;;  %327 = vst [vmem:[#allocation2 + $0x1c] sm:$0xf] %v323_v19  ;;  %v243_v24 = vshrl.u32 %v236_v9, 16  ;;  %v246_v25 = vshll.u32 %v236_v9, 16  ;;  %v2906_v26 = vor.u32 %v2306_v23, %v1716_v12  ;;  %v252_v27 = vshll.u32 %v237_v16, 16  ;;  %s2621_s19 = sshra.s32 %s1590_s11, 4  ;;  %s2622_s19 = int_to_ptr.hbm [resolvable:$true] %s2621_s19 }
  0x56   : > { %1222 = vmatpush.bf16.msrb.mxu3 %v2161_v1  ;;  %v256_v28 = vshrl.u32 %v237_v16, 16  ;;  %v262_v29 = vshll.u32 %v238_v17, 16  ;;  %v2307_v30 = vld [vmem:[#allocation3 + $0x4] sm:$0xf]  ;;  %v1726_v35 = vld [vmem:[#allocation3 + $0x10] sm:$0xf0]  ;;  %v2129_v43 = vor.u32 %v2407_v20, %v2126_v21  ;;  %p2628_p5 = scmp.lt.s32.totalorder %s2622_s19, %s3010_s3 }
  0x57   : > { %1181 = vmatpush.bf16.msrb.mxu0 %v1761_v10  ;;  %v245_v33 = vrot.slane %v243_v24, 4  ;;  %v248_v34 = vrot.slane %v246_v25, 5  ;;  %v2339_v36 = vld [vmem:[#allocation3 + $0x104] sm:$0xf]  ;;  %v1708_v38 = vld [vmem:[#allocation2] sm:$0xf]  ;;  %1156 = vmatmul.bf16.vlgmr.msra.gmra.mxu2 %v2906_v26  ;;  %v1729_v55 = vor.u32 %v2307_v30, %v1726_v35 }
  0x58   : > { %1195 = vmatpush.bf16.msrb.mxu1 %v1889_v11  ;;  %v254_v40 = vrot.slane %v252_v27, 5  ;;  %v258_v41 = vrot.slane %v256_v28, 4  ;;  %v264_v42 = vrot.slane %v262_v29, 5  ;;  %v2305_v44 = vld [vmem:[#allocation2 + $0xc] sm:$0xf0]  ;;  %s2623_s15 = scalar_lea.hbm %s2622_s19, 16 }
  0x59   : > { %1209 = vmatpush.bf16.msrb.mxu2 %v2017_v18  ;;  %v249_v45 = vor.u32 %v248_v34, %v245_v33  ;;  %v1854_v46 = vld [vmem:[#allocation3 + $0x110] sm:$0xf0]  ;;  %v2371_v47 = vld [vmem:[#allocation3 + $0x204] sm:$0xf]  ;;  %v2918_v48 = vor.u32 %v2305_v44, %v1708_v38  ;;  %v1844_v56 = vld [vmem:[#allocation3 + $0xe8] sm:$0xf]  ;;  %p2624_p1 = scmp.ne.s32.totalorder %s2622_s19, %s2623_s15 }
  0x5a   : > { %1223 = vmatpush.bf16.msrb.mxu3 %v2145_v22  ;;  %v259_v49 = vor.u32 %v258_v41, %v254_v40  ;;  %v1982_v50 = vld [vmem:[#allocation3 + $0x210] sm:$0xf0]  ;;  %v2403_v51 = vld [vmem:[#allocation3 + $0x304] sm:$0xf]  ;;  %v2304_v53 = vld [vmem:[#allocation2 + $0xc] sm:$0xf]  ;;  %v1857_v59 = vor.u32 %v2339_v36, %v1854_v46 }
  0x5b   : > { %v2110_v52 = vld [vmem:[#allocation3 + $0x310] sm:$0xf0]  ;;  %1182 = vmatpush.bf16.msrb.mxu0 %v1745_v31  ;;  %v250_v54 = vrot.slane %v249_v45, 4  ;;  %v1985_v60 = vor.u32 %v2371_v47, %v1982_v50  ;;  %v2338_v62 = vld [vmem:[#allocation3 + $0xf4] sm:$0xf0]  ;;  %p2625_p2 = pnand %p2624_p1, %p2763_p4  ;;  %s2627_s26 = scalar_lea.hbm %s3010_s3, 32 }
  0x5c   : > { %v1718_v57 = vld [vmem:[#allocation2 + $0x18] sm:$0xf0]  ;;  %1196 = vmatpush.bf16.msrb.mxu1 %v1873_v32  ;;  %v260_v58 = vrot.slane %v259_v49, 4  ;;  %v2113_v61 = vor.u32 %v2403_v51, %v2110_v52  ;;  %1128 = vmatmul.bf16.vlgmr.msra.gmra.mxu0 %v2918_v48  ;;  %v1845_v1 = vor.u32 %v2338_v62, %v1844_v56  ;;  %v2100_v2 = vld [vmem:[#allocation3 + $0x2e8] sm:$0xf]  ;;  %p2629_p6 = scmp.lt.s32.totalorder %s2627_s26, %s2623_s15 }
  0x5d   : > { %1210 = vmatpush.bf16.msrb.mxu2 %v2001_v37  ;;  %v2920_v63 = vor.u32 %v2304_v53, %v1718_v57  ;;  %v255_v0 = vsel %vm2913_vm8, %v250_v54, %v254_v40  ;;  %v2402_v4 = vld [vmem:[#allocation3 + $0x2f4] sm:$0xf0]  ;;  %v2228_v5 = vld [vmem:[#allocation3 + $0x3e8] sm:$0xf]  ;;  %p2626_p3 = pneg %p2625_p2 }
  0x5e   : > { %1224 = vmatpush.bf16.msrb.mxu3 %v2129_v43  ;;  %v265_v3 = vsel %vm2913_vm8, %v260_v58, %v264_v42  ;;  %268 = vst [vmem:[#allocation2 + $0x4] sm:$0xf] %v255_v0  ;;  %v2101_v6 = vor.u32 %v2402_v4, %v2100_v2  ;;  %v2434_v7 = vld [vmem:[#allocation3 + $0x3f4] sm:$0xf0]  ;;  %v1828_v8 = vld [vmem:[#allocation3 + $0xc8] sm:$0xf]  ;;  %p2630_p7 = por %p2629_p6, %p2628_p5 }
  0x5f   : > { %1170 = vmatmul.bf16.vlgmr.msra.gmra.mxu3 %v2920_v63  ;;  %269 = vst [vmem:[#allocation2 + $0x14] sm:$0xf] %v265_v3  ;;  %1183 = vmatpush.bf16.msrb.mxu0 %v1729_v55  ;;  %v2229_v9 = vor.u32 %v2434_v7, %v2228_v5  ;;  %v2334_v10 = vld [vmem:[#allocation3 + $0xd4] sm:$0xf0]  ;;  %v2084_v12 = vld [vmem:[#allocation3 + $0x2c8] sm:$0xf] }
  0x60   : > { %1197 = vmatpush.bf16.msrb.mxu1 %v1857_v59  ;;  %v1829_v11 = vor.u32 %v2334_v10, %v1828_v8  ;;  %v2398_v13 = vld [vmem:[#allocation3 + $0x2d4] sm:$0xf0]  ;;  %v2212_v14 = vld [vmem:[#allocation3 + $0x3c8] sm:$0xf]  ;;  %p2631_p9 = pnand %p2630_p7, %p2626_p3 }
  0x61   : > { %1211 = vmatpush.bf16.msrb.mxu2 %v1985_v60  ;;  %v2085_v15 = vor.u32 %v2398_v13, %v2084_v12  ;;  %v2430_v16 = vld [vmem:[#allocation3 + $0x3d4] sm:$0xf0]  ;;  %v1812_v17 = vld [vmem:[#allocation3 + $0xa8] sm:$0xf] }
  0x62   : > { %1225 = vmatpush.bf16.msrb.mxu3 %v2113_v61  ;;  %v2330_v18 = vld [vmem:[#allocation3 + $0xb4] sm:$0xf0]  ;;  %v1972_v19 = vld [vmem:[#allocation3 + $0x1e8] sm:$0xf]  ;;  %v2213_v21 = vor.u32 %v2430_v16, %v2212_v14 }
  0x63   : > { %1232 = vmatpush.bf16.msra.mxu0 %v1845_v1  ;;  %v2370_v20 = vld [vmem:[#allocation3 + $0x1f4] sm:$0xf0]  ;;  %v2068_v22 = vld [vmem:[#allocation3 + $0x2a8] sm:$0xf]  ;;  %v1813_v29 = vor.u32 %v2330_v18, %v1812_v17 }
  0x64   : > { %v2394_v23 = vld [vmem:[#allocation3 + $0x2b4] sm:$0xf0]  ;;  %v2196_v24 = vld [vmem:[#allocation3 + $0x3a8] sm:$0xf]  ;;  %v1973_v31 = vor.u32 %v2370_v20, %v1972_v19 }
  0x65   : > { %1260 = vmatpush.bf16.msra.mxu2 %v2101_v6  ;;  %v2426_v25 = vld [vmem:[#allocation3 + $0x3b4] sm:$0xf0]  ;;  %v2303_v27 = vld [vmem:[#allocation2 + $0x4] sm:$0xf]  ;;  %v1956_v28 = vld [vmem:[#allocation3 + $0x1c8] sm:$0xf]  ;;  %v2069_v32 = vor.u32 %v2394_v23, %v2068_v22 }
  0x66   : > { %1274 = vmatpush.bf16.msra.mxu3 %v2229_v9  ;;  %v1710_v30 = vld [vmem:[#allocation2 + $0x10] sm:$0xf0]  ;;  %v1796_v33 = vld [vmem:[#allocation3 + $0x88] sm:$0xf]  ;;  %v2326_v34 = vld [vmem:[#allocation3 + $0x94] sm:$0xf0]  ;;  %v2197_v37 = vor.u32 %v2426_v25, %v2196_v24 }
  0x67   : > { %1233 = vmatpush.bf16.msra.mxu0 %v1829_v11  ;;  %v2928_v35 = vor.u32 %v2303_v27, %v1710_v30  ;;  %v2366_v36 = vld [vmem:[#allocation3 + $0x1d4] sm:$0xf0]  ;;  %v2052_v38 = vld [vmem:[#allocation3 + $0x288] sm:$0xf]  ;;  %v1797_v42 = vor.u32 %v2326_v34, %v1796_v33  ;;  %1212 = vmatmul.bf16.vlgmr.msrb.gmra.mxu2 %v2906_v26  ;;  %v1846_v30 = vld [vmem:[#allocation3 + $0xf8] sm:$0xf0] }
  0x68   : > { %v2390_v39 = vld [vmem:[#allocation3 + $0x294] sm:$0xf0]  ;;  %v2180_v40 = vld [vmem:[#allocation3 + $0x388] sm:$0xf]  ;;  %v1957_v43 = vor.u32 %v2366_v36, %v1956_v28  ;;  %v2102_v33 = vld [vmem:[#allocation3 + $0x2f8] sm:$0xf0] }
  0x69   : > { %1261 = vmatpush.bf16.msra.mxu2 %v2085_v15  ;;  %v2422_v41 = vld [vmem:[#allocation3 + $0x394] sm:$0xf0]  ;;  %1142 = vmatmul.bf16.vlgmr.msra.gmra.mxu1 %v2928_v35  ;;  %v1940_v44 = vld [vmem:[#allocation3 + $0x1a8] sm:$0xf]  ;;  %v2053_v45 = vor.u32 %v2390_v39, %v2052_v38  ;;  %v2432_v34 = vld [vmem:[#allocation3 + $0x3ec] sm:$0xf] }
  0x6a   : > { %1275 = vmatpush.bf16.msra.mxu3 %v2213_v21  ;;  %1246 = vmatpush.bf16.msra.mxu1 %v1973_v31  ;;  %v1780_v46 = vld [vmem:[#allocation3 + $0x68] sm:$0xf]  ;;  %v2322_v47 = vld [vmem:[#allocation3 + $0x74] sm:$0xf0]  ;;  %v2181_v50 = vor.u32 %v2422_v41, %v2180_v40  ;;  %v2400_v31 = vld [vmem:[#allocation3 + $0x2ec] sm:$0xf] }
  0x6b   : > { %1234 = vmatpush.bf16.msra.mxu0 %v1813_v29  ;;  %v2362_v49 = vld [vmem:[#allocation3 + $0x1b4] sm:$0xf0]  ;;  %v2036_v51 = vld [vmem:[#allocation3 + $0x268] sm:$0xf]  ;;  %v1781_v55 = vor.u32 %v2322_v47, %v1780_v46  ;;  %v2336_v29 = vld [vmem:[#allocation3 + $0xec] sm:$0xf] }
  0x6c   : > { %v2386_v52 = vld [vmem:[#allocation3 + $0x274] sm:$0xf0]  ;;  %v2164_v53 = vld [vmem:[#allocation3 + $0x368] sm:$0xf]  ;;  %v1941_v56 = vor.u32 %v2362_v49, %v1940_v44  ;;  %1184 = vmatmul.bf16.vlgmr.msrb.gmra.mxu0 %v2918_v48  ;;  %v2230_v36 = vld [vmem:[#allocation3 + $0x3f8] sm:$0xf0] }
  0x6d   : > { %1262 = vmatpush.bf16.msra.mxu2 %v2069_v32  ;;  %v2418_v54 = vld [vmem:[#allocation3 + $0x374] sm:$0xf0]  ;;  %v1924_v57 = vld [vmem:[#allocation3 + $0x188] sm:$0xf]  ;;  %v2037_v58 = vor.u32 %v2386_v52, %v2036_v51  ;;  %v2233_v44 = vor.u32 %v2432_v34, %v2230_v36  ;;  %v1830_v46 = vld [vmem:[#allocation3 + $0xd8] sm:$0xf0] }
  0x6e   : > { %1276 = vmatpush.bf16.msra.mxu3 %v2197_v37  ;;  %1247 = vmatpush.bf16.msra.mxu1 %v1957_v43  ;;  %v1764_v59 = vld [vmem:[#allocation3 + $0x48] sm:$0xf]  ;;  %v2318_v60 = vld [vmem:[#allocation3 + $0x54] sm:$0xf0]  ;;  %v2165_v62 = vor.u32 %v2418_v54, %v2164_v53  ;;  %v2105_v43 = vor.u32 %v2400_v31, %v2102_v33  ;;  %v2396_v47 = vld [vmem:[#allocation3 + $0x2cc] sm:$0xf] }
  0x6f   : > { %1235 = vmatpush.bf16.msra.mxu0 %v1797_v42  ;;  %v2358_v61 = vld [vmem:[#allocation3 + $0x194] sm:$0xf0]  ;;  %v2020_v0 = vld [vmem:[#allocation3 + $0x248] sm:$0xf]  ;;  %1226 = vmatmul.bf16.vlgmr.msrb.gmra.mxu3 %v2920_v63  ;;  %v1765_v4 = vor.u32 %v2318_v60, %v1764_v59  ;;  %v1849_v42 = vor.u32 %v2336_v29, %v1846_v30  ;;  %v2086_v49 = vld [vmem:[#allocation3 + $0x2d8] sm:$0xf0] }
  0x70   : > { %v2382_v1 = vld [vmem:[#allocation3 + $0x254] sm:$0xf0]  ;;  %v2148_v2 = vld [vmem:[#allocation3 + $0x348] sm:$0xf]  ;;  %v1925_v5 = vor.u32 %v2358_v61, %v1924_v57  ;;  %v2214_v51 = vld [vmem:[#allocation3 + $0x3d8] sm:$0xf0] }
  0x71   : > { %1263 = vmatpush.bf16.msra.mxu2 %v2053_v45  ;;  %v2414_v3 = vld [vmem:[#allocation3 + $0x354] sm:$0xf0]  ;;  %v1908_v6 = vld [vmem:[#allocation3 + $0x168] sm:$0xf]  ;;  %v2021_v7 = vor.u32 %v2382_v1, %v2020_v0  ;;  %v2332_v45 = vld [vmem:[#allocation3 + $0xcc] sm:$0xf] }
  0x72   : > { %1277 = vmatpush.bf16.msra.mxu3 %v2181_v50  ;;  %1248 = vmatpush.bf16.msra.mxu1 %v1941_v56  ;;  %v1748_v8 = vld [vmem:[#allocation3 + $0x28] sm:$0xf]  ;;  %v2314_v9 = vld [vmem:[#allocation3 + $0x34] sm:$0xf0]  ;;  %v2149_v11 = vor.u32 %v2414_v3, %v2148_v2  ;;  %v2428_v50 = vld [vmem:[#allocation3 + $0x3cc] sm:$0xf]  ;;  %v1833_v57 = vor.u32 %v2332_v45, %v1830_v46 }
  0x73   : > { %1236 = vmatpush.bf16.msra.mxu0 %v1781_v55  ;;  %v2354_v10 = vld [vmem:[#allocation3 + $0x174] sm:$0xf0]  ;;  %v2004_v12 = vld [vmem:[#allocation3 + $0x228] sm:$0xf]  ;;  %v1749_v18 = vor.u32 %v2314_v9, %v1748_v8  ;;  %v2368_v55 = vld [vmem:[#allocation3 + $0x1ec] sm:$0xf]  ;;  %v2217_v59 = vor.u32 %v2428_v50, %v2214_v51 }
  0x74   : > { %v2378_v13 = vld [vmem:[#allocation3 + $0x234] sm:$0xf0]  ;;  %v2132_v14 = vld [vmem:[#allocation3 + $0x328] sm:$0xf]  ;;  %v1909_v19 = vor.u32 %v2354_v10, %v1908_v6  ;;  %v1974_v56 = vld [vmem:[#allocation3 + $0x1f8] sm:$0xf0] }
  0x75   : > { %1264 = vmatpush.bf16.msra.mxu2 %v2037_v58  ;;  %v2410_v15 = vld [vmem:[#allocation3 + $0x334] sm:$0xf0]  ;;  %v1892_v16 = vld [vmem:[#allocation3 + $0x148] sm:$0xf]  ;;  %v2005_v20 = vor.u32 %v2378_v13, %v2004_v12  ;;  %v2089_v58 = vor.u32 %v2396_v47, %v2086_v49  ;;  %v2328_v60 = vld [vmem:[#allocation3 + $0xac] sm:$0xf] }
  0x76   : > { %1278 = vmatpush.bf16.msra.mxu3 %v2165_v62  ;;  %v2350_v17 = vld [vmem:[#allocation3 + $0x154] sm:$0xf0]  ;;  %1249 = vmatpush.bf16.msra.mxu1 %v1925_v5  ;;  %v1732_v21 = vld [vmem:[#allocation3 + $0x8] sm:$0xf]  ;;  %v2133_v24 = vor.u32 %v2410_v15, %v2132_v14  ;;  %v1814_v61 = vld [vmem:[#allocation3 + $0xb8] sm:$0xf0] }
  0x77   : > { %1237 = vmatpush.bf16.msra.mxu0 %v1765_v4  ;;  %v2310_v22 = vld [vmem:[#allocation3 + $0x14] sm:$0xf0]  ;;  %v1988_v23 = vld [vmem:[#allocation3 + $0x208] sm:$0xf]  ;;  %v1893_v37 = vor.u32 %v2350_v17, %v1892_v16  ;;  %v2392_v62 = vld [vmem:[#allocation3 + $0x2ac] sm:$0xf]  ;;  %v1977_v4 = vor.u32 %v2368_v55, %v1974_v56 }
  0x78   : > { %v2374_v25 = vld [vmem:[#allocation3 + $0x214] sm:$0xf0]  ;;  %v2116_v27 = vld [vmem:[#allocation3 + $0x308] sm:$0xf]  ;;  %v1733_v32 = vor.u32 %v2310_v22, %v1732_v21  ;;  %v2070_v0 = vld [vmem:[#allocation3 + $0x2b8] sm:$0xf0] }
  0x79   : > { %1265 = vmatpush.bf16.msra.mxu2 %v2021_v7  ;;  %v2406_v28 = vld [vmem:[#allocation3 + $0x314] sm:$0xf0]  ;;  %1198 = vmatmul.bf16.vlgmr.msrb.gmra.mxu1 %v2928_v35  ;;  %v1989_v38 = vor.u32 %v2374_v25, %v1988_v23  ;;  %v1876_v39 = vld [vmem:[#allocation3 + $0x128] sm:$0xf]  ;;  %v2424_v1 = vld [vmem:[#allocation3 + $0x3ac] sm:$0xf]  ;;  %v1817_v7 = vor.u32 %v2328_v60, %v1814_v61  ;;  %v2073_v8 = vor.u32 %v2392_v62, %v2070_v0 }
  0x7a   : > { %1279 = vmatpush.bf16.msra.mxu3 %v2149_v11  ;;  %1250 = vmatpush.bf16.msra.mxu1 %v1909_v19  ;;  %v2346_v40 = vld [vmem:[#allocation3 + $0x134] sm:$0xf0]  ;;  %v2117_v41 = vor.u32 %v2406_v28, %v2116_v27  ;;  %v1860_v53 = vld [vmem:[#allocation3 + $0x108] sm:$0xf]  ;;  %v2198_v2 = vld [vmem:[#allocation3 + $0x3b8] sm:$0xf0] }
  0x7b   : > { %1238 = vmatpush.bf16.msra.mxu0 %v1749_v18  ;;  %v1877_v52 = vor.u32 %v2346_v40, %v1876_v39  ;;  %v2342_v54 = vld [vmem:[#allocation3 + $0x114] sm:$0xf0]  ;;  %v2364_v5 = vld [vmem:[#allocation3 + $0x1cc] sm:$0xf]  ;;  %v1958_v6 = vld [vmem:[#allocation3 + $0x1d8] sm:$0xf0]  ;;  %v2201_v9 = vor.u32 %v2424_v1, %v2198_v2 }
  0x7c   : > { %v1861_v3 = vor.u32 %v2342_v54, %v1860_v53  ;;  %v2324_v10 = vld [vmem:[#allocation3 + $0x8c] sm:$0xf]  ;;  %v1798_v11 = vld [vmem:[#allocation3 + $0x98] sm:$0xf0]  ;;  %v1961_v16 = vor.u32 %v2364_v5, %v1958_v6 }
  0x7d   : > { %1266 = vmatpush.bf16.msra.mxu2 %v2005_v20  ;;  %v2388_v12 = vld [vmem:[#allocation3 + $0x28c] sm:$0xf]  ;;  %v2054_v13 = vld [vmem:[#allocation3 + $0x298] sm:$0xf0]  ;;  %v1801_v19 = vor.u32 %v2324_v10, %v1798_v11 }
  0x7e   : > { %1280 = vmatpush.bf16.msra.mxu3 %v2133_v24  ;;  %1251 = vmatpush.bf16.msra.mxu1 %v1893_v37  ;;  %v2420_v14 = vld [vmem:[#allocation3 + $0x38c] sm:$0xf]  ;;  %v2182_v15 = vld [vmem:[#allocation3 + $0x398] sm:$0xf0]  ;;  %v2057_v20 = vor.u32 %v2388_v12, %v2054_v13 }
  0x7f   : > { %1239 = vmatpush.bf16.msra.mxu0 %v1733_v32  ;;  %v2360_v17 = vld [vmem:[#allocation3 + $0x1ac] sm:$0xf]  ;;  %v1942_v18 = vld [vmem:[#allocation3 + $0x1b8] sm:$0xf0]  ;;  %v2185_v21 = vor.u32 %v2420_v14, %v2182_v15 }
  0x80   : > { %v2320_v22 = vld [vmem:[#allocation3 + $0x6c] sm:$0xf]  ;;  %v1782_v23 = vld [vmem:[#allocation3 + $0x78] sm:$0xf0]  ;;  %v1945_v29 = vor.u32 %v2360_v17, %v1942_v18 }
  0x81   : > { %1267 = vmatpush.bf16.msra.mxu2 %v1989_v38  ;;  %v2384_v24 = vld [vmem:[#allocation3 + $0x26c] sm:$0xf]  ;;  %v2038_v25 = vld [vmem:[#allocation3 + $0x278] sm:$0xf0]  ;;  %v1785_v32 = vor.u32 %v2320_v22, %v1782_v23 }
  0x82   : > { %1281 = vmatpush.bf16.msra.mxu3 %v2117_v41  ;;  %1240 = vmatmul.bf16.vlgmr.msra.gmra.mxu0 %v2918_v48  ;;  %v2416_v27 = vld [vmem:[#allocation3 + $0x36c] sm:$0xf]  ;;  %v2166_v28 = vld [vmem:[#allocation3 + $0x378] sm:$0xf0]  ;;  %v2041_v33 = vor.u32 %v2384_v24, %v2038_v25  ;;  %v2441_v25 = vld [vmem:[#allocation6 + $0x30] sm:$0xff] }
  0x83   : > { %1288 = vmatpush.bf16.msrb.mxu0 %v1849_v42  ;;  %1252 = vmatpush.bf16.msra.mxu1 %v1877_v52  ;;  %v2356_v30 = vld [vmem:[#allocation3 + $0x18c] sm:$0xf]  ;;  %v1926_v31 = vld [vmem:[#allocation3 + $0x198] sm:$0xf0]  ;;  %v2169_v34 = vor.u32 %v2416_v27, %v2166_v28 }
  0x84   : > { %1268 = vmatmul.bf16.vlgmr.msra.gmra.mxu2 %v2906_v26  ;;  %v2316_v36 = vld [vmem:[#allocation3 + $0x4c] sm:$0xf]  ;;  %v1766_v37 = vld [vmem:[#allocation3 + $0x58] sm:$0xf0]  ;;  %v1929_v42 = vor.u32 %v2356_v30, %v1926_v31  ;;  %v2439_v30 = vld [vmem:[#allocation6 + $0x20] sm:$0xff] }
  0x85   : > { %1316 = vmatpush.bf16.msrb.mxu2 %v2105_v43  ;;  %1282 = vmatmul.bf16.vlgmr.msra.gmra.mxu3 %v2920_v63  ;;  %v2380_v38 = vld [vmem:[#allocation3 + $0x24c] sm:$0xf]  ;;  %v2022_v39 = vld [vmem:[#allocation3 + $0x258] sm:$0xf0]  ;;  %v1769_v45 = vor.u32 %v2316_v36, %v1766_v37 }
  0x86   : > { %1330 = vmatpush.bf16.msrb.mxu3 %v2233_v44  ;;  %v2412_v40 = vld [vmem:[#allocation3 + $0x34c] sm:$0xf]  ;;  %v2150_v41 = vld [vmem:[#allocation3 + $0x358] sm:$0xf0]  ;;  %v2025_v46 = vor.u32 %v2380_v38, %v2022_v39 }
  0x87   : > { %1289 = vmatpush.bf16.msrb.mxu0 %v1833_v57  ;;  %1253 = vmatpush.bf16.msra.mxu1 %v1861_v3  ;;  %v2352_v43 = vld [vmem:[#allocation3 + $0x16c] sm:$0xf]  ;;  %v1910_v44 = vld [vmem:[#allocation3 + $0x178] sm:$0xf0]  ;;  %v2153_v47 = vor.u32 %v2412_v40, %v2150_v41 }
  0x88   : > { %v2312_v49 = vld [vmem:[#allocation3 + $0x2c] sm:$0xf]  ;;  %v1750_v50 = vld [vmem:[#allocation3 + $0x38] sm:$0xf0]  ;;  %v1913_v55 = vor.u32 %v2352_v43, %v1910_v44  ;;  %v2437_v43 = vld [vmem:[#allocation6 + $0x10] sm:$0xff] }
  0x89   : > { %1317 = vmatpush.bf16.msrb.mxu2 %v2089_v58  ;;  %v2376_v51 = vld [vmem:[#allocation3 + $0x22c] sm:$0xf]  ;;  %v2006_v52 = vld [vmem:[#allocation3 + $0x238] sm:$0xf0]  ;;  %v1753_v58 = vor.u32 %v2312_v49, %v1750_v50 }
  0x8a   : > { %1331 = vmatpush.bf16.msrb.mxu3 %v2217_v59  ;;  %1254 = vmatmul.bf16.vlgmr.msra.gmra.mxu1 %v2928_v35  ;;  %v2408_v53 = vld [vmem:[#allocation3 + $0x32c] sm:$0xf]  ;;  %v2134_v54 = vld [vmem:[#allocation3 + $0x338] sm:$0xf0]  ;;  %v2009_v59 = vor.u32 %v2376_v51, %v2006_v52 }
  0x8b   : > { %1302 = vmatpush.bf16.msrb.mxu1 %v1977_v4  ;;  %1290 = vmatpush.bf16.msrb.mxu0 %v1817_v7  ;;  %v2348_v56 = vld [vmem:[#allocation3 + $0x14c] sm:$0xf]  ;;  %v1894_v57 = vld [vmem:[#allocation3 + $0x158] sm:$0xf0]  ;;  %v2137_v60 = vor.u32 %v2408_v53, %v2134_v54 }
  0x8c   : > { %v2308_v61 = vld [vmem:[#allocation3 + $0xc] sm:$0xf]  ;;  %v1734_v62 = vld [vmem:[#allocation3 + $0x18] sm:$0xf0]  ;;  %v1897_v4 = vor.u32 %v2348_v56, %v1894_v57 }
  0x8d   : > { %1318 = vmatpush.bf16.msrb.mxu2 %v2073_v8  ;;  %v2372_v0 = vld [vmem:[#allocation3 + $0x20c] sm:$0xf]  ;;  %v1990_v1 = vld [vmem:[#allocation3 + $0x218] sm:$0xf0]  ;;  %v1737_v5 = vor.u32 %v2308_v61, %v1734_v62 }
  0x8e   : > { %1332 = vmatpush.bf16.msrb.mxu3 %v2201_v9  ;;  %v2404_v2 = vld [vmem:[#allocation3 + $0x30c] sm:$0xf]  ;;  %v2118_v3 = vld [vmem:[#allocation3 + $0x318] sm:$0xf0]  ;;  %v1993_v8 = vor.u32 %v2372_v0, %v1990_v1  ;;  %v2449_v0 = vld [vmem:[#allocation6 + $0x70] sm:$0xff] }
  0x8f   : > { %1303 = vmatpush.bf16.msrb.mxu1 %v1961_v16  ;;  %1291 = vmatpush.bf16.msrb.mxu0 %v1801_v19  ;;  %v2344_v6 = vld [vmem:[#allocation3 + $0x12c] sm:$0xf]  ;;  %v1878_v7 = vld [vmem:[#allocation3 + $0x138] sm:$0xf0]  ;;  %v2121_v9 = vor.u32 %v2404_v2, %v2118_v3 }
  0x90   : > { %v1881_v10 = vor.u32 %v2344_v6, %v1878_v7  ;;  %v2340_v11 = vld [vmem:[#allocation3 + $0x10c] sm:$0xf]  ;;  %v1862_v12 = vld [vmem:[#allocation3 + $0x118] sm:$0xf0] }
  0x91   : > { %1319 = vmatpush.bf16.msrb.mxu2 %v2057_v20  ;;  %v1865_v13 = vor.u32 %v2340_v11, %v1862_v12  ;;  %v2440_v27 = vld [vmem:[#allocation6 + $0x28] sm:$0xff] }
  0x92   : > { %1333 = vmatpush.bf16.msrb.mxu3 %v2185_v21  ;;  %v2436_v52 = vld [vmem:[#allocation6 + $0x8] sm:$0xff] }
  0x93   : > { %1304 = vmatpush.bf16.msrb.mxu1 %v1945_v29  ;;  %1292 = vmatpush.bf16.msrb.mxu0 %v1785_v32 }
  0x95   : > { %1320 = vmatpush.bf16.msrb.mxu2 %v2041_v33 }
  0x96   : > { %1334 = vmatpush.bf16.msrb.mxu3 %v2169_v34  ;;  %v2438_v34 = vld [vmem:[#allocation6 + $0x18] sm:$0xff] }
  0x97   : > { %1305 = vmatpush.bf16.msrb.mxu1 %v1929_v42  ;;  %1293 = vmatpush.bf16.msrb.mxu0 %v1769_v45 }
  0x99   : > { %1321 = vmatpush.bf16.msrb.mxu2 %v2025_v46 }
  0x9a   : > { %1335 = vmatpush.bf16.msrb.mxu3 %v2153_v47 }
  0x9b   : > { %1306 = vmatpush.bf16.msrb.mxu1 %v1913_v55  ;;  %1294 = vmatpush.bf16.msrb.mxu0 %v1753_v58  ;;  %v2435_v58 = vld [vmem:[#allocation6] sm:$0xff] }
  0x9d   : > { %1322 = vmatpush.bf16.msrb.mxu2 %v2009_v59 }
  0x9e   : > { %1336 = vmatpush.bf16.msrb.mxu3 %v2137_v60  ;;  %v2450_v60 = vld [vmem:[#allocation6 + $0x78] sm:$0xff] }
  0x9f   : > { %1307 = vmatpush.bf16.msrb.mxu1 %v1897_v4  ;;  %1295 = vmatpush.bf16.msrb.mxu0 %v1737_v5  ;;  %v2448_v4 = vld [vmem:[#allocation6 + $0x68] sm:$0xff] }
  0xa1   : > { %1323 = vmatpush.bf16.msrb.mxu2 %v1993_v8  ;;  %v2447_v8 = vld [vmem:[#allocation6 + $0x60] sm:$0xff] }
  0xa2   : > { %1337 = vmatpush.bf16.msrb.mxu3 %v2121_v9  ;;  %1296 = vmatmul.bf16.vlgmr.msrb.gmra.mxu0 %v2918_v48  ;;  %v2442_v48 = vld [vmem:[#allocation6 + $0x38] sm:$0xff] }
  0xa3   : > { %1308 = vmatpush.bf16.msrb.mxu1 %v1881_v10  ;;  %1534 = vmatpush.bf16.msra.mxu0 %v2442_v48 }
  0xa4   : > { %1324 = vmatmul.bf16.vlgmr.msrb.gmra.mxu2 %v2906_v26 }
  0xa5   : > { %1338 = vmatmul.bf16.vlgmr.msrb.gmra.mxu3 %v2920_v63 }
  0xa7   : > { %1309 = vmatpush.bf16.msrb.mxu1 %v1865_v13  ;;  %1535 = vmatpush.bf16.msra.mxu0 %v2441_v25 }
  0xaa   : > { %1310 = vmatmul.bf16.vlgmr.msrb.gmra.mxu1 %v2928_v35 }
  0xab   : > { %1536 = vmatpush.bf16.msra.mxu0 %v2440_v27  ;;  %1548 = vmatpush.bf16.msra.mxu1 %v2450_v60 }
  0xaf   : > { %1537 = vmatpush.bf16.msra.mxu0 %v2439_v30  ;;  %1549 = vmatpush.bf16.msra.mxu1 %v2449_v0 }
  0xb3   : > { %1538 = vmatpush.bf16.msra.mxu0 %v2438_v34  ;;  %1550 = vmatpush.bf16.msra.mxu1 %v2448_v4  ;;  %v2444_v34 = vld [vmem:[#allocation6 + $0x48] sm:$0xff] }
  0xb7   : > { %1539 = vmatpush.bf16.msra.mxu0 %v2437_v43  ;;  %1551 = vmatpush.bf16.msra.mxu1 %v2447_v8 }
  0xbb   : > { %1540 = vmatpush.bf16.msra.mxu0 %v2436_v52 }
  0xbf   : > { %1541 = vmatpush.bf16.msra.mxu0 %v2435_v58 }
  0xd9   : > { %v1129_v14 = vpop.f32.mrf.mxu0 }
  0xda   : > { %v1157_v15 = vpop.f32.mrf.mxu2 }
  0xe1   : > { %v1131_v18 = vpop.f32.mrf.mxu0 }
  0xe2   : > { %v1171_v16 = vpop.f32.mrf.mxu3  ;;  %v1159_v19 = vpop.f32.mrf.mxu2 }
  0xe6   : > { %v1143_v17 = vpop.f32.mrf.mxu1 }
  0xe7   : > { %v1144_v31 = vadd.f32 %v1143_v17, %v1129_v14  ;;  %v2446_v14 = vld [vmem:[#allocation6 + $0x58] sm:$0xff] }
  0xe8   : > { %1552 = vmatpush.bf16.msra.mxu1 %v2446_v14 }
  0xe9   : > { %v1185_v22 = vpop.f32.mrf.mxu0  ;;  %v1158_v36 = vadd.f32 %v1157_v15, %v1144_v31 }
  0xea   : > { %v1173_v20 = vpop.f32.mrf.mxu3  ;;  %v2943_v23 = vpop.f32.mrf.mxu2 }
  0xeb   : > { %v1172_v40 = vadd.f32 %v1171_v16, %v1158_v36 }
  0xed   : > { %v1344_v46 = vmul.f32 %v1172_v40, %v1172_v40 }
  0xee   : > { %v1145_v21 = vpop.f32.mrf.mxu1 }
  0xef   : > { %v1146_v41 = vadd.f32 %v1145_v21, %v1131_v18 }
  0xf1   : > { %v2947_v63 = vpop.f32.mrf.mxu0  ;;  %v1160_v47 = vadd.f32 %v1159_v19, %v1146_v41 }
  0xf2   : > { %v2945_v24 = vpop.f32.mrf.mxu3  ;;  %v2949_v35 = vpop.f32.mrf.mxu2 }
  0xf3   : > { %v1174_v56 = vadd.f32 %v1173_v20, %v1160_v47 }
  0xf5   : > { %v1346_v61 = vmul.f32 %v1174_v56, %v1174_v56 }
  0xf6   : > { %v1199_v26 = vpop.f32.mrf.mxu1 }
  0xf7   : > { %v1200_v7 = vadd.f32 %v1199_v26, %v1185_v22  ;;  %v2445_v22 = vld [vmem:[#allocation6 + $0x50] sm:$0xff] }
  0xf8   : > { %1553 = vmatpush.bf16.msra.mxu1 %v2445_v22 }
  0xf9   : > { %v1214_v13 = vadd.f32 %v2943_v23, %v1200_v7 }
  0xfa   : > { %v2951_v28 = vpop.f32.mrf.mxu3 }
  0xfb   : > { %v1228_v21 = vadd.f32 %v2945_v24, %v1214_v13 }
  0xfc   : > { %1554 = vmatpush.bf16.msra.mxu1 %v2444_v34 }
  0xfe   : > { %v2953_v29 = vpop.f32.mrf.mxu1 }
  0xff   : > { %v1241_v32 = vpop.f32.mrf.mxu0  ;;  %v1202_v26 = vadd.f32 %v2953_v29, %v2947_v63 }
 0x101   : > { %v1216_v24 = vadd.f32 %v2949_v35, %v1202_v26  ;;  %v2443_v35 = vld [vmem:[#allocation6 + $0x40] sm:$0xff] }
 0x102   : > { %1555 = vmatpush.bf16.msra.mxu1 %v2443_v35 }
 0x107   : > { %v1269_v33 = vpop.f32.mrf.mxu2  ;;  %v1255_v37 = vpop.f32.mrf.mxu1 }
 0x108   : > { %v1283_v38 = vpop.f32.mrf.mxu3  ;;  %v1256_v39 = vadd.f32 %v1255_v37, %v1241_v32  ;;  %v1243_v45 = vpop.f32.mrf.mxu0  ;;  %v1345_v32 = vmul.f32 %v1228_v21, %v1228_v21 }
 0x10a   : > { %v1270_v42 = vadd.f32 %v1269_v33, %v1256_v39 }
 0x10c   : > { %v1284_v44 = vadd.f32 %v1283_v38, %v1270_v42 }
 0x10e   : > { %v1348_v49 = vmul.f32 %v1284_v44, %v1284_v44 }
 0x10f   : > { %v1257_v50 = vpop.f32.mrf.mxu1  ;;  %v1271_v51 = vpop.f32.mrf.mxu2 }
 0x110   : > { %v2955_v53 = vadd.f32 %v1348_v49, %v1344_v46  ;;  %v1258_v54 = vadd.f32 %v1257_v50, %v1243_v45  ;;  %v1285_v55 = vpop.f32.mrf.mxu3  ;;  %v1230_v46 = vadd.f32 %v2951_v28, %v1216_v24 }
 0x112   : > { %2535 = vrsqrt.f32 %v2955_v53  ;;  %v1272_v57 = vadd.f32 %v1271_v51, %v1258_v54  ;;  %vm1363_vm9 = vcmp.eq.f32.partialorder %v2955_v53, inf  ;;  %vm1365_vm10 = vcmp.eq.f32.partialorder %v2955_v53, 0.0 }
 0x113   : > { %v1366_v29 = vand.u32 2147483648, %v2955_v53  ;;  %v1347_v52 = vmul.f32 %v1230_v46, %v1230_v46 }
 0x114   : > { %v1286_v59 = vadd.f32 %v1285_v55, %v1272_v57 }
 0x116   : > { %v1350_v62 = vmul.f32 %v1286_v59, %v1286_v59 }
 0x118   : > { %v2536_v1 = vpop.eup %2535  ;;  %v1354_v2 = vadd.f32 %v1350_v62, %v1346_v61 }
 0x119   : > { %v1357_v3 = vmul.f32 %v2536_v1, %v2955_v53 }
 0x11a   : > { %2537 = vrsqrt.f32 %v1354_v2  ;;  %vm1387_vm11 = vcmp.eq.f32.partialorder %v1354_v2, inf  ;;  %v1390_v40 = vand.u32 2147483648, %v1354_v2  ;;  %vm1389_vm12 = vcmp.eq.f32.partialorder %v1354_v2, 0.0 }
 0x11b   : > { %v1358_v5 = vmul.f32 %v2536_v1, %v1357_v3 }
 0x11d   : > { %v1359_v6 = vmul.f32 0.5, %v1358_v5 }
 0x11f   : > { %v1360_v9 = vsub.f32 1.5, %v1359_v6  ;;  %v1297_v11 = vpop.f32.mrf.mxu0 }
 0x120   : > { %v2538_v10 = vpop.eup %2537 }
 0x121   : > { %v1381_v12 = vmul.f32 %v2538_v10, %v1354_v2  ;;  %v1361_v16 = vmul.f32 %v2536_v1, %v1360_v9 }
 0x123   : > { %v1382_v17 = vmul.f32 %v2538_v10, %v1381_v12  ;;  %v1362_v27 = vmul.f32 %v1361_v16, %v2955_v53 }
 0x125   : > { %v1383_v20 = vmul.f32 0.5, %v1382_v17  ;;  %v1364_v37 = vsel %vm1363_vm9, %v2955_v53, %v1362_v27 }
 0x126   : > { %v1367_v44 = vsel %vm1365_vm10, %v1366_v29, %v1364_v37 }
 0x127   : > { %v1325_v15 = vpop.f32.mrf.mxu2  ;;  %v1311_v18 = vpop.f32.mrf.mxu1  ;;  %v1384_v23 = vsub.f32 1.5, %v1383_v20 }
 0x128   : > { %v1312_v19 = vadd.f32 %v1311_v18, %v1297_v11  ;;  %v1339_v48 = vpop.f32.mrf.mxu3  ;;  %v1299_v33 = vpop.f32.mrf.mxu0 }
 0x129   : > { %v1385_v31 = vmul.f32 %v2538_v10, %v1384_v23 }
 0x12a   : > { %v1326_v25 = vadd.f32 %v1325_v15, %v1312_v19 }
 0x12b   : > { %v1386_v38 = vmul.f32 %v1385_v31, %v1354_v2 }
 0x12c   : > { %v1340_v30 = vadd.f32 %v1339_v48, %v1326_v25 }
 0x12d   : > { %v1388_v43 = vsel %vm1387_vm11, %v1354_v2, %v1386_v38 }
 0x12e   : > { %v1349_v36 = vmul.f32 %v1340_v30, %v1340_v30  ;;  %v1391_v45 = vsel %vm1389_vm12, %v1390_v40, %v1388_v43 }
 0x12f   : > { %v1313_v39 = vpop.f32.mrf.mxu1  ;;  %v1327_v63 = vpop.f32.mrf.mxu2  ;;  %v1404_v49 = vpack.c.bf16 %v1391_v45, %v1367_v44 }
 0x130   : > { %v1353_v41 = vadd.f32 %v1349_v36, %v1345_v32  ;;  %v1314_v42 = vadd.f32 %v1313_v39, %v1299_v33  ;;  %v1341_v50 = vpop.f32.mrf.mxu3 }
 0x131   : > { %1542 = vmatmul.bf16.vlgmr.msra.gmra.mxu0 %v1404_v49 }
 0x132   : > { %2539 = vrsqrt.f32 %v1353_v41  ;;  %v1328_v47 = vadd.f32 %v1327_v63, %v1314_v42  ;;  %vm1375_vm13 = vcmp.eq.f32.partialorder %v1353_v41, inf  ;;  %v1378_v6 = vand.u32 2147483648, %v1353_v41 }
 0x133   : > { %vm1377_vm15 = vcmp.eq.f32.partialorder %v1353_v41, 0.0 }
 0x134   : > { %v1342_v51 = vadd.f32 %v1341_v50, %v1328_v47 }
 0x136   : > { %v1351_v53 = vmul.f32 %v1342_v51, %v1342_v51 }
 0x138   : > { %v2540_v54 = vpop.eup %2539  ;;  %v1355_v55 = vadd.f32 %v1351_v53, %v1347_v52 }
 0x139   : > { %v1369_v56 = vmul.f32 %v2540_v54, %v1353_v41 }
 0x13a   : > { %2541 = vrsqrt.f32 %v1355_v55  ;;  %vm1399_vm14 = vcmp.eq.f32.partialorder %v1355_v55, inf  ;;  %v1402_v7 = vand.u32 2147483648, %v1355_v55  ;;  %vm1401_vm0 = vcmp.eq.f32.partialorder %v1355_v55, 0.0 }
 0x13b   : > { %v1370_v57 = vmul.f32 %v2540_v54, %v1369_v56 }
 0x13d   : > { %v1371_v58 = vmul.f32 0.5, %v1370_v57 }
 0x13f   : > { %v1372_v59 = vsub.f32 1.5, %v1371_v58 }
 0x140   : > { %v2542_v60 = vpop.eup %2541 }
 0x141   : > { %v1393_v61 = vmul.f32 %v2542_v60, %v1355_v55  ;;  %v1373_v62 = vmul.f32 %v2540_v54, %v1372_v59 }
 0x143   : > { %v1394_v28 = vmul.f32 %v2542_v60, %v1393_v61  ;;  %v1374_v1 = vmul.f32 %v1373_v62, %v1353_v41 }
 0x145   : > { %v1395_v0 = vmul.f32 0.5, %v1394_v28  ;;  %v1376_v4 = vsel %vm1375_vm13, %v1353_v41, %v1374_v1 }
 0x146   : > { %v1379_v9 = vsel %vm1377_vm15, %v1378_v6, %v1376_v4 }
 0x147   : > { %v1396_v2 = vsub.f32 1.5, %v1395_v0 }
 0x149   : > { %v1397_v3 = vmul.f32 %v2542_v60, %v1396_v2 }
 0x14b   : > { %v1398_v5 = vmul.f32 %v1397_v3, %v1355_v55 }
 0x14d   : > { %v1400_v8 = vsel %vm1399_vm14, %v1355_v55, %v1398_v5 }
 0x14e   : > { %v1403_v10 = vsel %vm1401_vm0, %v1402_v7, %v1400_v8 }
 0x14f   : > { %v1405_v11 = vpack.c.bf16 %v1403_v10, %v1379_v9 }
 0x151   : > { %1556 = vmatmul.bf16.vlgmr.msra.gmra.mxu1 %v1405_v11 }
 0x1ae   : > { %v1543_v12 = vpop.f32.mrf.mxu0 }
 0x1b6   : > { %v1545_v16 = vpop.f32.mrf.mxu0 }
 0x1ce   : > { %v1557_v13 = vpop.f32.mrf.mxu1 }
 0x1cf   : > { %v1558_v14 = vadd.f32 %v1557_v13, %v1543_v12 }
 0x1d1   : > { %v1562_v15 = vmax.f32 %v1558_v14, 1e-05 }
 0x1d3   : > { %2543 = vlog2.f32 %v1562_v15 }
 0x1d6   : > { %v1559_v17 = vpop.f32.mrf.mxu1 }
 0x1d7   : > { %v1560_v18 = vadd.f32 %v1559_v17, %v1545_v16 }
 0x1d9   : > { %v2544_v19 = vpop.eup %2543  ;;  %v1563_v20 = vmax.f32 %v1560_v18, 1e-05 }
 0x1da   : > { %v1565_v21 = vmul.f32 0.6931472, %v2544_v19 }
 0x1db   : > { %2545 = vlog2.f32 %v1563_v20 }
 0x1dc   : > { %v1568_v48 = vmul.f32 0.4342945, %v1565_v21 }
 0x1de   : > { %1570 = vst [vmem:[%s221_s6] sm:$0xff] %v1568_v48 }
 0x1e1   : > { %v2546_v22 = vpop.eup %2545 }
 0x1e2   : > { %v1567_v26 = vmul.f32 0.6931472, %v2546_v22 }
 0x1e4   : > { %v1569_v25 = vmul.f32 0.4342945, %v1567_v26 }
 0x1e6   : > { %1571 = vst [vmem:[%s221_s6 + $0x8] sm:$0xff] %v1569_v25 }
 0x1e7   : > { %2634 = shalt.err (!%p2631_p9)
}
 0x1e8   : > { %s2701_s29 = smov 128   ;;  %s2702_s30 = smov 8  }
 0x1e9   : > { %2461 = dma.vmem_to_hbm [thread:$0]  (%p2763_p4), %s1588_s10, 256, %s1590_s11, %s1573_s18, %s2701_s29, %s2701_s29, %s2702_s30  }
 0x1ea PF: > { %p2478_p10 = scmp.ge.s32.totalorder %s2693_s17, 2  ;;  %s1604_s4 = sand.u32 1, %s2673_s12  }
 0x1eb   : > { %s1605_s5 = scalar_lea.sflag [#allocation5], %s1604_s4 }
 0x1ec   : > { %p2471_p11 = pnand %p2478_p10, %p2770_p8 }
 0x1ee   : > { %p2472_p12 = pneg %p2471_p11 }
 0x1f0   : > { %2668 = dma.done.wait (%p2472_p12), %s1605_s5, 256  }
 0x1f1   : > { %2670 = vsyncadd (%p2472_p12), %s1605_s5, 4294967040  ;;  %s18_s17 = sadd.s32 1, %s2693_s17   ;;  %s3021_s12 = smov %s2677_s13 }
 0x1f2   : > { %p15_p13 = scmp.ge.s32.totalorder %s18_s17, 4   ;;  %s3022_s13 = smov %s2681_s14 }
 0x1f3   : > { %s3023_s14 = smov %s2776_s25  ;;  %s3024_s15 = smov %s2689_s16 }
 0x1f4   : > { %s3025_s16 = smov %s3027_s20  ;;  %17 = sbr.rel (!%p15_p13) target bundleno = 6 (0x6), region = 76 }
 0x1f9   :  { %1611 = vsyncpa [#allocation4], 1 }
 0x1fa   :  { %1613 = vsyncpa [#allocation4 + $0x1], 1 }
 0x1fb   :  { %1614 = vsyncpa [#allocation7], 1 }
 0x1fc   :  { %1615 = vsyncpa [#allocation5], 1 }
 0x1fd   :  { %1617 = vsyncpa [#allocation5 + $0x1], 1 }

</bundles_post_ra>
